<compile_context>
chip_gen: v7x
topology: tpu7x:2x2x1
jax: 0.10.0
libtpu: 0.0.40
codegen_flags: <defaults>
</compile_context>

<pallas_src>
import functools
import math

import jax
import jax.numpy as jnp
from jax.experimental import pallas as pl
from jax.experimental.pallas import tpu as pltpu

H1 = 1024
H2 = 512


def _round_up(n, m):
    return ((n + m - 1) // m) * m


# ----------------------------------------------------------------------------
# Kernel
# ----------------------------------------------------------------------------
def _pointnet_head_kernel(x_ref, w1_ref, b1_ref, w2_ref, b2_ref,
                          wh_ref, bh_ref, out_ref):
    """One batch tile: FC1+ReLU -> FC2+ReLU -> fused (transl|rot) head.

    Weights are bf16 and VMEM-resident across the whole grid; MXU operands
    are bf16 with f32 accumulation (preferred_element_type).  Bias-add/ReLU
    run in f32 (safe on v5e's f32-only VALU), but h1/h2 are *stored* bf16 so
    the large activation tiles never sit in VMEM/vregs as f32.
    """
    x = x_ref[...].astype(jnp.bfloat16)                              # (TB, Din)

    h1 = jnp.dot(x, w1_ref[...],
                 preferred_element_type=jnp.float32) + b1_ref[...]
    h1 = jnp.maximum(h1, 0.0).astype(jnp.bfloat16)                   # (TB, 1024) bf16

    h2 = jnp.dot(h1, w2_ref[...],
                 preferred_element_type=jnp.float32) + b2_ref[...]
    h2 = jnp.maximum(h2, 0.0).astype(jnp.bfloat16)                   # (TB, 512) bf16

    # Fused heads: one K=512 pass, lane-dense 128-wide zero-padded output.
    out_ref[...] = (jnp.dot(h2, wh_ref[...],
                            preferred_element_type=jnp.float32)
                    + bh_ref[...]).astype(out_ref.dtype)


# ----------------------------------------------------------------------------
# Capability probe: pipeline_mode=pl.Buffered(1) (single-buffered residents)
# ----------------------------------------------------------------------------
@functools.lru_cache(maxsize=None)
def _buffered_one_supported():
    """Probe once whether BlockSpec(pipeline_mode=pl.Buffered(1)) lowers and
    compiles on this jax/libtpu build.  Falls back to default (double
    buffering) otherwise, so the main kernel always runs."""
    try:
        def _copy(x_ref, o_ref):
            o_ref[...] = x_ref[...]

        fn = pl.pallas_call(
            _copy,
            out_shape=jax.ShapeDtypeStruct((8, 128), jnp.float32),
            grid=(1,),
            in_specs=[pl.BlockSpec((8, 128), lambda i: (0, 0),
                                   pipeline_mode=pl.Buffered(1))],
            out_specs=pl.BlockSpec((8, 128), lambda i: (0, 0)),
        )
        jax.jit(fn).lower(jnp.zeros((8, 128), jnp.float32)).compile()
        return True
    except Exception:
        return False


# ----------------------------------------------------------------------------
# Batch tile selection
# ----------------------------------------------------------------------------
def _pick_batch_tile(B):
    """Small B: one grid step (splitting a small batch over v7x's two cores
    would only duplicate the weight DMA).  Large B: pick 256- vs 128-row
    tiles minimizing padded work, then preferring an even step count (even
    split over v7x's two TensorCores), then fewer/bigger steps."""
    if B <= 256:
        return _round_up(max(B, 1), 8)
    best_key, best_tb = None, 256
    for tb in (256, 128):
        bp = _round_up(B, tb)
        steps = bp // tb
        key = (bp, steps % 2, steps)
        if best_key is None or key < best_key:
            best_key, best_tb = key, tb
    return best_tb


# ----------------------------------------------------------------------------
# Wrapper
# ----------------------------------------------------------------------------
def pointnet_head_forward(x, params, compute_transl=True, compute_rotation=True):
    """x.view(B, -1) + fused FC1/FC2/heads Pallas kernel.  Returns (transl, yaw)."""
    if not (compute_transl or compute_rotation):
        return None, None
    return _forward_impl(x, params, compute_transl, compute_rotation,
                         _buffered_one_supported())


@functools.partial(
    jax.jit,
    static_argnames=("compute_transl", "compute_rotation", "use_buffered_weights"))
def _forward_impl(x, params, compute_transl, compute_rotation,
                  use_buffered_weights):
    B = x.shape[0]
    x2d = x.reshape(B, -1)              # keep upstream dtype (bf16 stays bf16)
    Din = x2d.shape[1]

    w1, b1 = params["w1"], params["b1"]
    w2, b2 = params["w2"], params["b2"]
    wt, bt = params["wt"], params["bt"]
    wr, br = params["wr"], params["br"]
    n_rot = wr.shape[1]

    # ---- pad the FC1 contracting dim to a lane multiple (zero rows in w1) ----
    din_p = _round_up(Din, 128)
    if din_p != Din:
        x2d = jnp.pad(x2d, ((0, 0), (0, din_p - Din)))
        w1 = jnp.pad(w1, ((0, din_p - Din), (0, 0)))

    # ---- fused head weight: only the requested heads, lane-dense output ----
    head_ws, head_bs = [], []
    col = 0
    t_off = r_off = None
    if compute_transl:
        head_ws.append(wt); head_bs.append(bt); t_off = col; col += 3
    if compute_rotation:
        head_ws.append(wr); head_bs.append(br); r_off = col; col += n_rot
    head_n = max(128, _round_up(col, 128))
    wh = jnp.pad(jnp.concatenate(head_ws, axis=1),
                 ((0, 0), (0, head_n - col))).astype(jnp.bfloat16)
    bh = jnp.pad(jnp.concatenate(head_bs, axis=1),
                 ((0, 0), (0, head_n - col))).astype(jnp.float32)

    # ---- batch tiling ----
    tb = _pick_batch_tile(B)
    bp = _round_up(B, tb)
    if bp != B:
        x2d = jnp.pad(x2d, ((0, bp - B), (0, 0)))
    grid = (bp // tb,)

    # ---- cost / VMEM bookkeeping ----
    xbytes = x2d.dtype.itemsize
    w_bytes = ((w1.size + w2.size + wh.size) * 2          # bf16 weights
               + (b1.size + b2.size + bh.size) * 4)       # f32 biases
    flops = 2 * bp * (din_p * H1 + H1 * H2 + H2 * head_n)
    bytes_accessed = x2d.size * xbytes + bp * head_n * 4 + w_bytes

    vmem_est = ((1 if use_buffered_weights else 2) * w_bytes   # resident params
                + 2 * tb * din_p * xbytes                      # x tile (dbl-buffered)
                + 2 * tb * head_n * 4                          # out tile (dbl-buffered)
                + tb * (H1 + H2) * 4)                          # in-flight activations
    vmem_limit = None
    if vmem_est > 24 * 1024 * 1024:
        # Large-Din configs only: raise the scoped-VMEM limit explicitly
        # (v7x scoped default is 32 MiB of 64 MiB physical).
        vmem_limit = min(int(vmem_est * 5 // 4), 96 * 1024 * 1024)

    def _resident(shape):
        # Constant index_map blocks: single VMEM buffer when supported.
        if use_buffered_weights:
            return pl.BlockSpec(shape, lambda i: (0, 0),
                                pipeline_mode=pl.Buffered(1))
        return pl.BlockSpec(shape, lambda i: (0, 0))

    out_pad = pl.pallas_call(
        _pointnet_head_kernel,
        out_shape=jax.ShapeDtypeStruct((bp, head_n), jnp.float32),
        grid_spec=pltpu.PrefetchScalarGridSpec(
            num_scalar_prefetch=0,
            grid=grid,
            in_specs=[
                pl.BlockSpec((tb, din_p), lambda i: (i, 0)),   # x tile (pipelined)
                _resident((din_p, H1)),                        # w1 (resident)
                _resident((1, H1)),                            # b1
                _resident((H1, H2)),                           # w2 (resident)
                _resident((1, H2)),                            # b2
                _resident((H2, head_n)),                       # fused head W
                _resident((1, head_n)),                        # fused head b
            ],
            out_specs=pl.BlockSpec((tb, head_n), lambda i: (i, 0)),
        ),
        compiler_params=pltpu.CompilerParams(
            dimension_semantics=("parallel",),                 # v7x: 2 TCs split batch
            vmem_limit_bytes=vmem_limit,
        ),
        cost_estimate=pl.CostEstimate(
            flops=flops, transcendentals=0, bytes_accessed=bytes_accessed),
    )(x2d, w1, b1, w2, b2, wh, bh)

    transl = out_pad[:B, t_off:t_off + 3] if compute_transl else None
    rot = out_pad[:B, r_off:r_off + n_rot] if compute_rotation else None
    return transl, rot


# ----------------------------------------------------------------------------
# Params / reference
# ----------------------------------------------------------------------------
def init_pointnet_head_params(key, input_dim, rotation_parameters=2):
    """PyTorch-style uniform(-1/sqrt(fan_in)) init.

    Weights stored as (in_features, out_features) in bf16 (MXU-native);
    biases stored as (1, out_features) in f32."""
    def linear(key, fan_in, fan_out):
        kw, kb = jax.random.split(key)
        bound = 1.0 / math.sqrt(fan_in)
        w = jax.random.uniform(kw, (fan_in, fan_out), jnp.float32, -bound, bound)
        b = jax.random.uniform(kb, (1, fan_out), jnp.float32, -bound, bound)
        return w.astype(jnp.bfloat16), b

    k1, k2, k3, k4 = jax.random.split(key, 4)
    w1, b1 = linear(k1, input_dim * 2, H1)
    w2, b2 = linear(k2, H1, H2)
    wt, bt = linear(k3, H2, 3)
    wr, br = linear(k4, H2, rotation_parameters)
    return dict(w1=w1, b1=b1, w2=w2, b2=b2, wt=wt, bt=bt, wr=wr, br=br)


def _reference_forward(x, params, compute_transl=True, compute_rotation=True):
    """Plain-JAX reference with the same bf16-operand / f32-accumulate /
    bf16-activation-storage scheme as the kernel."""
    def mm(a_bf16, w_bf16):
        return jnp.dot(a_bf16.astype(jnp.float32), w_bf16.astype(jnp.float32))

    x2d = x.reshape(x.shape[0], -1).astype(jnp.bfloat16)
    h1 = jnp.maximum(mm(x2d, params["w1"]) + params["b1"], 0.0).astype(jnp.bfloat16)
    h2 = jnp.maximum(mm(h1, params["w2"]) + params["b2"], 0.0).astype(jnp.bfloat16)
    transl = mm(h2, params["wt"]) + params["bt"] if compute_transl else None
    rot = mm(h2, params["wr"]) + params["br"] if compute_rotation else None
    return transl, rot


if __name__ == "__main__":
    # Small shapes consistent with the module: input_dim=32 -> flattened dim 64.
    B = 2
    INPUT_DIM = 32
    ROT_PARAMS = 2

    key = jax.random.PRNGKey(0)
    k_x, k_p = jax.random.split(key)

    # x is (B, 2, input_dim): two concatenated per-sample feature vectors,
    # matching x.view(B, -1) -> (B, 2*input_dim).
    x = jax.random.normal(k_x, (B, 2, INPUT_DIM), dtype=jnp.float32)
    params = init_pointnet_head_params(k_p, INPUT_DIM, ROT_PARAMS)

    # Both heads.
    transl, yaw = pointnet_head_forward(x, params,
                                        compute_transl=True,
                                        compute_rotation=True)
    jax.block_until_ready((transl, yaw))

    ref_t, ref_y = _reference_forward(x, params)
    assert transl.shape == (B, 3) and yaw.shape == (B, ROT_PARAMS)
    assert jnp.allclose(transl, ref_t, atol=2e-3, rtol=2e-3)
    assert jnp.allclose(yaw, ref_y, atol=2e-3, rtol=2e-3)

    # Single-head variants (flags are static -> separate, smaller kernels).
    t_only, y_none = pointnet_head_forward(x, params,
                                           compute_transl=True,
                                           compute_rotation=False)
    jax.block_until_ready(t_only)
    assert y_none is None
    assert jnp.allclose(t_only, ref_t, atol=2e-3, rtol=2e-3)

    t_none, y_only = pointnet_head_forward(x, params,
                                           compute_transl=False,
                                           compute_rotation=True)
    jax.block_until_ready(y_only)
    assert t_none is None
    assert jnp.allclose(y_only, ref_y, atol=2e-3, rtol=2e-3)

    print("KERNEL_OK")
</pallas_src>

<mosaic_0001>
module attributes {stable_mosaic.version = 11 : i64} {
  func.func @_pointnet_head_kernel(%arg0: i32, %arg1: memref<8x128xf32, #tpu.memory_space<vmem>>, %arg2: memref<128x1024xbf16, #tpu.memory_space<vmem>>, %arg3: memref<1x1024xf32, #tpu.memory_space<vmem>>, %arg4: memref<1024x512xbf16, #tpu.memory_space<vmem>>, %arg5: memref<1x512xf32, #tpu.memory_space<vmem>>, %arg6: memref<512x128xbf16, #tpu.memory_space<vmem>>, %arg7: memref<1x128xf32, #tpu.memory_space<vmem>>, %arg8: memref<8x128xf32, #tpu.memory_space<vmem>>) attributes {dimension_semantics = [#tpu.dimension_semantics<parallel>], iteration_bounds = array<i64: 1>, scalar_prefetch = 0 : i64, scratch_operands = 0 : i64, tpu.core_type = #tpu.core_type<tc>, window_params = [{transform_indices = @transform_0, window_bounds = array<i64: 8, 128>}, {pipeline_mode = #tpu.pipeline_mode<synchronous>, transform_indices = @transform_1, window_bounds = array<i64: 128, 1024>}, {pipeline_mode = #tpu.pipeline_mode<synchronous>, transform_indices = @transform_2, window_bounds = array<i64: 1, 1024>}, {pipeline_mode = #tpu.pipeline_mode<synchronous>, transform_indices = @transform_3, window_bounds = array<i64: 1024, 512>}, {pipeline_mode = #tpu.pipeline_mode<synchronous>, transform_indices = @transform_4, window_bounds = array<i64: 1, 512>}, {pipeline_mode = #tpu.pipeline_mode<synchronous>, transform_indices = @transform_5, window_bounds = array<i64: 512, 128>}, {pipeline_mode = #tpu.pipeline_mode<synchronous>, transform_indices = @transform_6, window_bounds = array<i64: 1, 128>}, {transform_indices = @transform_7, window_bounds = array<i64: 8, 128>}]} {
    %c0 = arith.constant 0 : index
    %c0_0 = arith.constant 0 : index
    %0 = vector.load %arg1[%c0, %c0_0] : memref<8x128xf32, #tpu.memory_space<vmem>>, vector<8x128xf32>
    %1 = arith.truncf %0 : vector<8x128xf32> to vector<8x128xbf16>
    %c0_1 = arith.constant 0 : index
    %c0_2 = arith.constant 0 : index
    %2 = vector.load %arg2[%c0_1, %c0_2] : memref<128x1024xbf16, #tpu.memory_space<vmem>>, vector<128x1024xbf16>
    %cst = arith.constant dense<0.000000e+00> : vector<8x1024xf32>
    %3 = tpu.matmul %1, %2, %cst {dimension_numbers = #tpu.dot_dimension_numbers<[1], [0], [0], [1], [0, 0, 1, 1], [], []>} : vector<8x128xbf16>, vector<128x1024xbf16>, vector<8x1024xf32> -> vector<8x1024xf32>
    %c0_3 = arith.constant 0 : index
    %c0_4 = arith.constant 0 : index
    %4 = vector.load %arg3[%c0_3, %c0_4] : memref<1x1024xf32, #tpu.memory_space<vmem>>, vector<1x1024xf32>
    %5 = vector.broadcast %4 : vector<1x1024xf32> to vector<8x1024xf32>
    %6 = arith.addf %3, %5 : vector<8x1024xf32>
    %cst_5 = arith.constant 0.000000e+00 : f32
    %7 = vector.broadcast %cst_5 : f32 to vector<8x1024xf32>
    %8 = arith.maximumf %6, %7 : vector<8x1024xf32>
    %9 = arith.truncf %8 : vector<8x1024xf32> to vector<8x1024xbf16>
    %c0_6 = arith.constant 0 : index
    %c0_7 = arith.constant 0 : index
    %10 = vector.load %arg4[%c0_6, %c0_7] : memref<1024x512xbf16, #tpu.memory_space<vmem>>, vector<1024x512xbf16>
    %cst_8 = arith.constant dense<0.000000e+00> : vector<8x512xf32>
    %11 = tpu.matmul %9, %10, %cst_8 {dimension_numbers = #tpu.dot_dimension_numbers<[1], [0], [0], [1], [0, 0, 1, 1], [], []>} : vector<8x1024xbf16>, vector<1024x512xbf16>, vector<8x512xf32> -> vector<8x512xf32>
    %c0_9 = arith.constant 0 : index
    %c0_10 = arith.constant 0 : index
    %12 = vector.load %arg5[%c0_9, %c0_10] : memref<1x512xf32, #tpu.memory_space<vmem>>, vector<1x512xf32>
    %13 = vector.broadcast %12 : vector<1x512xf32> to vector<8x512xf32>
    %14 = arith.addf %11, %13 : vector<8x512xf32>
    %cst_11 = arith.constant 0.000000e+00 : f32
    %15 = vector.broadcast %cst_11 : f32 to vector<8x512xf32>
    %16 = arith.maximumf %14, %15 : vector<8x512xf32>
    %17 = arith.truncf %16 : vector<8x512xf32> to vector<8x512xbf16>
    %c0_12 = arith.constant 0 : index
    %c0_13 = arith.constant 0 : index
    %18 = vector.load %arg6[%c0_12, %c0_13] : memref<512x128xbf16, #tpu.memory_space<vmem>>, vector<512x128xbf16>
    %cst_14 = arith.constant dense<0.000000e+00> : vector<8x128xf32>
    %19 = tpu.matmul %17, %18, %cst_14 {dimension_numbers = #tpu.dot_dimension_numbers<[1], [0], [0], [1], [0, 0, 1, 1], [], []>} : vector<8x512xbf16>, vector<512x128xbf16>, vector<8x128xf32> -> vector<8x128xf32>
    %c0_15 = arith.constant 0 : index
    %c0_16 = arith.constant 0 : index
    %20 = vector.load %arg7[%c0_15, %c0_16] : memref<1x128xf32, #tpu.memory_space<vmem>>, vector<1x128xf32>
    %21 = vector.broadcast %20 : vector<1x128xf32> to vector<8x128xf32>
    %22 = arith.addf %19, %21 : vector<8x128xf32>
    %c0_17 = arith.constant 0 : index
    %c0_18 = arith.constant 0 : index
    %23 = vector.load %arg8[%c0_17, %c0_18] : memref<8x128xf32, #tpu.memory_space<vmem>>, vector<8x128xf32>
    tpu.vector_store %arg8[%c0_17, %c0_18], %22 {strides = array<i32>} : memref<8x128xf32, #tpu.memory_space<vmem>>, vector<8x128xf32>,
    return
  }
  func.func @transform_0(%arg0: i32) -> (i32, i32) {
    %c0_i32 = arith.constant 0 : i32
    %c0_i32_0 = arith.constant 0 : i32
    return %arg0, %c0_i32 : i32, i32
  }
  func.func @transform_1(%arg0: i32) -> (i32, i32) {
    %c0_i32 = arith.constant 0 : i32
    %c0_i32_0 = arith.constant 0 : i32
    %c0_i32_1 = arith.constant 0 : i32
    return %c0_i32, %c0_i32_0 : i32, i32
  }
  func.func @transform_2(%arg0: i32) -> (i32, i32) {
    %c0_i32 = arith.constant 0 : i32
    %c0_i32_0 = arith.constant 0 : i32
    %c0_i32_1 = arith.constant 0 : i32
    return %c0_i32, %c0_i32_0 : i32, i32
  }
  func.func @transform_3(%arg0: i32) -> (i32, i32) {
    %c0_i32 = arith.constant 0 : i32
    %c0_i32_0 = arith.constant 0 : i32
    %c0_i32_1 = arith.constant 0 : i32
    return %c0_i32, %c0_i32_0 : i32, i32
  }
  func.func @transform_4(%arg0: i32) -> (i32, i32) {
    %c0_i32 = arith.constant 0 : i32
    %c0_i32_0 = arith.constant 0 : i32
    %c0_i32_1 = arith.constant 0 : i32
    return %c0_i32, %c0_i32_0 : i32, i32
  }
  func.func @transform_5(%arg0: i32) -> (i32, i32) {
    %c0_i32 = arith.constant 0 : i32
    %c0_i32_0 = arith.constant 0 : i32
    %c0_i32_1 = arith.constant 0 : i32
    return %c0_i32, %c0_i32_0 : i32, i32
  }
  func.func @transform_6(%arg0: i32) -> (i32, i32) {
    %c0_i32 = arith.constant 0 : i32
    %c0_i32_0 = arith.constant 0 : i32
    %c0_i32_1 = arith.constant 0 : i32
    return %c0_i32, %c0_i32_0 : i32, i32
  }
  func.func @transform_7(%arg0: i32) -> (i32, i32) {
    %c0_i32 = arith.constant 0 : i32
    %c0_i32_0 = arith.constant 0 : i32
    return %arg0, %c0_i32 : i32, i32
  }
}

</mosaic_0001>

<bundles_post_ra>
// kernel: _forward_impl.1
= control target key start
LH: loop header
LB: loop body
LE: loop exit
PB: predicated region body
PF: predicated region fallthrough
CT: control target
= control target key end

     0   :  { %12 = vsyncpa [#allocation3], 0  ;;  %s3761_s24 = smov [#allocation2]   ;;  %s4181_s0 = inlined_call_operand.vmem [shape: f32[8,128], index: 0, kind: input, shape index: {}]   ;;  %s4182_s1 = inlined_call_operand.vmem [shape: bf16[128,1024], index: 1, kind: input, shape index: {}]   ;;  %s4183_s2 = inlined_call_operand.vmem [shape: f32[1,1024], index: 2, kind: input, shape index: {}]   ;;  %s4184_s3 = inlined_call_operand.hbm [shape: bf16[1024,512], index: 3, kind: input, shape index: {}]   ;;  %s4185_s4 = inlined_call_operand.vmem [shape: f32[1,512], index: 4, kind: input, shape index: {}]   ;;  %s4186_s5 = inlined_call_operand.vmem [shape: bf16[512,128], index: 5, kind: input, shape index: {}]   ;;  %s4187_s6 = inlined_call_operand.vmem [shape: f32[1,128], index: 6, kind: input, shape index: {}]   ;;  %s4188_s7 = inlined_call_operand.vmem [shape: f32[8,128], index: 7, kind: output, shape index: {}]  }
   0x1   :  { %s24_s25 = sshll.u32 %s3761_s24, 4  ;;  %s3737_s28 = scalar_lea.hbm %s4184_s3, 32768  ;;  %s25_s25 = int_to_ptr.vmem [resolvable:$true] %s24_s25 }
   0x2   :  { %p3738_p0 = scmp.ne.s32.totalorder %s4184_s3, %s3737_s28  ;;  %p3741_p1 = scmp.lt.u32.totalorder %s3737_s28, %s4184_s3 }
   0x4   :  { %p3743_p2 = pnand %p3741_p1, %p3738_p0 }
   0x6   :  { %3746 = shalt.err (!%p3743_p2)
}
   0x7   :  { %s3747_s10 = scalar_lea.vmem %s25_s25, 32768  ;;  %p3752_p4 = scmp.lt.s32.totalorder %s25_s25, %s25_s25 }
   0x8   :  { %p3748_p3 = scmp.ne.s32.totalorder %s25_s25, %s3747_s10  ;;  %p3753_p5 = scmp.lt.s32.totalorder %s3747_s10, %s3747_s10 }
   0xa   :  { %p3754_p6 = por %p3753_p5, %p3752_p4 }
   0xc   :  { %p3755_p7 = pnand %p3754_p6, %p3748_p3 }
   0xe   :  { %3758 = shalt.err (!%p3755_p7)
}
   0xf   :  { %s3762_s11 = smov 256   ;;  %s3763_s12 = smov 16  }
  0x10   :  { %30 = dma.hbm_to_vmem [thread:$0]  %s4184_s3, 32768, %s25_s25, [#allocation3], %s3762_s11, %s3762_s11, %s3763_s12  }
  0x11   :  { %3759 = dma.done.wait [#allocation3], 32768  }
  0x12   :  { %3760 = vsyncadd [#allocation3], 4294934528  ;;  %v3764_v0 = vmov 0   ;;  %v43_v1 = vld [vmem:[%s4182_s1] sm:$0xff]  ;;  %v44_v14 = vld [vmem:[%s4182_s1 + $0x8] sm:$0xff] }
  0x13   :  { %501 = vmatprep.mubr.bf16.mxu0 %v3764_v0  ;;  %542 = vmatprep.mubr.bf16.mxu1 %v3764_v0  ;;  %v47_v2 = vld [vmem:[%s4182_s1 + $0x20] sm:$0xff]  ;;  %v48_v15 = vld [vmem:[%s4182_s1 + $0x28] sm:$0xff]  ;;  %v45_v59 = vld [vmem:[%s4182_s1 + $0x10] sm:$0xff] }
  0x14   :  { %v51_v3 = vld [vmem:[%s4182_s1 + $0x40] sm:$0xff]  ;;  %v2893_v4 = vcombine.high %v43_v1, %v47_v2  ;;  %v2892_v5 = vcombine.low %v43_v1, %v47_v2  ;;  %v52_v16 = vld [vmem:[%s4182_s1 + $0x48] sm:$0xff]  ;;  %v2895_v18 = vcombine.high %v44_v14, %v48_v15  ;;  %v2894_v19 = vcombine.low %v44_v14, %v48_v15  ;;  %v49_v60 = vld [vmem:[%s4182_s1 + $0x30] sm:$0xff] }
  0x15   :  { %v55_v6 = vld [vmem:[%s4182_s1 + $0x60] sm:$0xff]  ;;  %v56_v17 = vld [vmem:[%s4182_s1 + $0x68] sm:$0xff]  ;;  %v2897_v2 = vcombine.high %v45_v59, %v49_v60  ;;  %v65_v14 = vld [vmem:[%s4182_s1 + $0xb0] sm:$0xff] }
  0x16   :  { %v2901_v7 = vcombine.high %v51_v3, %v55_v6  ;;  %v59_v8 = vld [vmem:[%s4182_s1 + $0x80] sm:$0xff]  ;;  %469 = vmatprep.subr.bf16.mxu0 %v2893_v4  ;;  %v2900_v10 = vcombine.low %v51_v3, %v55_v6  ;;  %v2903_v20 = vcombine.high %v52_v16, %v56_v17  ;;  %v60_v22 = vld [vmem:[%s4182_s1 + $0x88] sm:$0xff]  ;;  %510 = vmatprep.subr.bf16.mxu1 %v2895_v18  ;;  %v53_v4 = vld [vmem:[%s4182_s1 + $0x50] sm:$0xff] }
  0x17   :  { %v63_v9 = vld [vmem:[%s4182_s1 + $0xa0] sm:$0xff]  ;;  %470 = vmatpush1.bf16.msra.mxu0 %v2892_v5  ;;  %v64_v23 = vld [vmem:[%s4182_s1 + $0xa8] sm:$0xff]  ;;  %511 = vmatpush1.bf16.msra.mxu1 %v2894_v19  ;;  %v2902_v27 = vcombine.low %v52_v16, %v56_v17  ;;  %v57_v5 = vld [vmem:[%s4182_s1 + $0x70] sm:$0xff] }
  0x18   :  { %471 = vmatprep.subr.bf16.mxu0 %v2901_v7  ;;  %v2909_v11 = vcombine.high %v59_v8, %v63_v9  ;;  %v67_v12 = vld [vmem:[%s4182_s1 + $0xc0] sm:$0xff]  ;;  %v2908_v21 = vcombine.low %v59_v8, %v63_v9  ;;  %512 = vmatprep.subr.bf16.mxu1 %v2903_v20  ;;  %v2911_v28 = vcombine.high %v60_v22, %v64_v23  ;;  %v68_v30 = vld [vmem:[%s4182_s1 + $0xc8] sm:$0xff]  ;;  %v46_v8 = vld [vmem:[%s4182_s1 + $0x18] sm:$0xff] }
  0x19   :  { %v71_v13 = vld [vmem:[%s4182_s1 + $0xe0] sm:$0xff]  ;;  %v72_v31 = vld [vmem:[%s4182_s1 + $0xe8] sm:$0xff]  ;;  %v2910_v35 = vcombine.low %v60_v22, %v64_v23  ;;  %v2896_v9 = vcombine.low %v45_v59, %v49_v60  ;;  %v54_v16 = vld [vmem:[%s4182_s1 + $0x58] sm:$0xff]  ;;  %v2904_v17 = vcombine.low %v53_v4, %v57_v5 }
  0x1a   :  { %v2917_v24 = vcombine.high %v67_v12, %v71_v13  ;;  %v75_v25 = vld [vmem:[%s4182_s1 + $0x100] sm:$0xff]  ;;  %v2916_v29 = vcombine.low %v67_v12, %v71_v13  ;;  %v2919_v36 = vcombine.high %v68_v30, %v72_v31  ;;  %v76_v38 = vld [vmem:[%s4182_s1 + $0x108] sm:$0xff]  ;;  %v2918_v43 = vcombine.low %v68_v30, %v72_v31  ;;  %v61_v13 = vld [vmem:[%s4182_s1 + $0x90] sm:$0xff] }
  0x1b   :  { %472 = vmatpush1.bf16.msra.mxu0 %v2900_v10  ;;  %v79_v26 = vld [vmem:[%s4182_s1 + $0x120] sm:$0xff]  ;;  %513 = vmatpush1.bf16.msra.mxu1 %v2902_v27  ;;  %v80_v39 = vld [vmem:[%s4182_s1 + $0x128] sm:$0xff]  ;;  %v50_v10 = vld [vmem:[%s4182_s1 + $0x38] sm:$0xff]  ;;  %v2913_v19 = vcombine.high %v61_v13, %v65_v14 }
  0x1c   :  { %473 = vmatprep.subr.bf16.mxu0 %v2909_v11  ;;  %v2925_v32 = vcombine.high %v75_v25, %v79_v26  ;;  %v83_v33 = vld [vmem:[%s4182_s1 + $0x140] sm:$0xff]  ;;  %514 = vmatprep.subr.bf16.mxu1 %v2911_v28  ;;  %v2924_v37 = vcombine.low %v75_v25, %v79_v26  ;;  %v2927_v44 = vcombine.high %v76_v38, %v80_v39  ;;  %v84_v46 = vld [vmem:[%s4182_s1 + $0x148] sm:$0xff]  ;;  %v58_v18 = vld [vmem:[%s4182_s1 + $0x78] sm:$0xff] }
  0x1d   :  { %v87_v34 = vld [vmem:[%s4182_s1 + $0x160] sm:$0xff]  ;;  %v88_v47 = vld [vmem:[%s4182_s1 + $0x168] sm:$0xff]  ;;  %v2926_v51 = vcombine.low %v76_v38, %v80_v39  ;;  %v2905_v11 = vcombine.high %v53_v4, %v57_v5  ;;  %v2899_v15 = vcombine.high %v46_v8, %v50_v10  ;;  %v69_v20 = vld [vmem:[%s4182_s1 + $0xd0] sm:$0xff]  ;;  %v2898_v22 = vcombine.low %v46_v8, %v50_v10 }
  0x1e   :  { %v2933_v40 = vcombine.high %v83_v33, %v87_v34  ;;  %v91_v41 = vld [vmem:[%s4182_s1 + $0x180] sm:$0xff]  ;;  %v2932_v45 = vcombine.low %v83_v33, %v87_v34  ;;  %v2935_v52 = vcombine.high %v84_v46, %v88_v47  ;;  %v92_v53 = vld [vmem:[%s4182_s1 + $0x188] sm:$0xff]  ;;  %v2934_v58 = vcombine.low %v84_v46, %v88_v47  ;;  %v66_v26 = vld [vmem:[%s4182_s1 + $0xb8] sm:$0xff] }
  0x1f   :  { %474 = vmatpush1.bf16.msra.mxu0 %v2908_v21  ;;  %v95_v42 = vld [vmem:[%s4182_s1 + $0x1a0] sm:$0xff]  ;;  %515 = vmatpush1.bf16.msra.mxu1 %v2910_v35  ;;  %v96_v55 = vld [vmem:[%s4182_s1 + $0x1a8] sm:$0xff]  ;;  %v73_v21 = vld [vmem:[%s4182_s1 + $0xf0] sm:$0xff]  ;;  %v2907_v23 = vcombine.high %v54_v16, %v58_v18  ;;  %v2912_v25 = vcombine.low %v61_v13, %v65_v14  ;;  %v2906_v30 = vcombine.low %v54_v16, %v58_v18 }
  0x20   :  { %475 = vmatprep.subr.bf16.mxu0 %v2917_v24  ;;  %516 = vmatprep.subr.bf16.mxu1 %v2919_v36  ;;  %v2941_v48 = vcombine.high %v91_v41, %v95_v42  ;;  %v99_v49 = vld [vmem:[%s4182_s1 + $0x1c0] sm:$0xff]  ;;  %v2940_v54 = vcombine.low %v91_v41, %v95_v42  ;;  %v2943_v61 = vcombine.high %v92_v53, %v96_v55  ;;  %v100_v62 = vld [vmem:[%s4182_s1 + $0x1c8] sm:$0xff]  ;;  %v62_v24 = vld [vmem:[%s4182_s1 + $0x98] sm:$0xff] }
  0x21   :  { %v103_v50 = vld [vmem:[%s4182_s1 + $0x1e0] sm:$0xff]  ;;  %v104_v1 = vld [vmem:[%s4182_s1 + $0x1e8] sm:$0xff]  ;;  %v2942_v3 = vcombine.low %v92_v53, %v96_v55  ;;  %v2921_v27 = vcombine.high %v69_v20, %v73_v21  ;;  %v77_v28 = vld [vmem:[%s4182_s1 + $0x110] sm:$0xff]  ;;  %v2915_v31 = vcombine.high %v62_v24, %v66_v26  ;;  %v2920_v33 = vcombine.low %v69_v20, %v73_v21 }
  0x22   :  { %v2949_v56 = vcombine.high %v99_v49, %v103_v50  ;;  %v41_v57 = vld [vmem:[%s4181_s0] sm:$0xff]  ;;  %v2948_v63 = vcombine.low %v99_v49, %v103_v50  ;;  %v2951_v7 = vcombine.high %v100_v62, %v104_v1  ;;  %v2950_v12 = vcombine.low %v100_v62, %v104_v1  ;;  %v74_v34 = vld [vmem:[%s4182_s1 + $0xf8] sm:$0xff]  ;;  %v85_v36 = vld [vmem:[%s4182_s1 + $0x150] sm:$0xff] }
  0x23   :  { %476 = vmatpush1.bf16.msra.mxu0 %v2916_v29  ;;  %517 = vmatpush1.bf16.msra.mxu1 %v2918_v43  ;;  %v3930_v6 = vpack.c.bf16 %v41_v57, %v41_v57  ;;  %v81_v29 = vld [vmem:[%s4182_s1 + $0x130] sm:$0xff]  ;;  %v78_v39 = vld [vmem:[%s4182_s1 + $0x118] sm:$0xff] }
  0x24   :  { %477 = vmatprep.subr.bf16.mxu0 %v2925_v32  ;;  %518 = vmatprep.subr.bf16.mxu1 %v2927_v44  ;;  %v70_v32 = vld [vmem:[%s4182_s1 + $0xd8] sm:$0xff]  ;;  %v2929_v35 = vcombine.high %v77_v28, %v81_v29  ;;  %v93_v43 = vld [vmem:[%s4182_s1 + $0x190] sm:$0xff] }
  0x25   :  { %v2923_v38 = vcombine.high %v70_v32, %v74_v34  ;;  %v82_v41 = vld [vmem:[%s4182_s1 + $0x138] sm:$0xff]  ;;  %v97_v44 = vld [vmem:[%s4182_s1 + $0x1b0] sm:$0xff] }
  0x26   :  { %v2931_v46 = vcombine.high %v78_v39, %v82_v41  ;;  %v86_v47 = vld [vmem:[%s4182_s1 + $0x158] sm:$0xff]  ;;  %v2945_v50 = vcombine.high %v93_v43, %v97_v44  ;;  %v2930_v53 = vcombine.low %v78_v39, %v82_v41  ;;  %v3329_v5 = vld [vmem:[#allocation2 + $0x24] ss:$16 sps:$4 sm:$0xff]   ;;  %v3333_v13 = vld [vmem:[#allocation2 + $0x40] ss:$16 sps:$4 sm:$0xff]  }
  0x27   :  { %478 = vmatpush1.bf16.msra.mxu0 %v2924_v37  ;;  %519 = vmatpush1.bf16.msra.mxu1 %v2926_v51  ;;  %v2914_v37 = vcombine.low %v62_v24, %v66_v26  ;;  %v90_v49 = vld [vmem:[%s4182_s1 + $0x178] sm:$0xff]  ;;  %v101_v51 = vld [vmem:[%s4182_s1 + $0x1d0] sm:$0xff] }
  0x28   :  { %479 = vmatprep.subr.bf16.mxu0 %v2933_v40  ;;  %520 = vmatprep.subr.bf16.mxu1 %v2935_v52  ;;  %v2928_v40 = vcombine.low %v77_v28, %v81_v29  ;;  %v105_v52 = vld [vmem:[%s4182_s1 + $0x1f0] sm:$0xff]  ;;  %v94_v55 = vld [vmem:[%s4182_s1 + $0x198] sm:$0xff]  ;;  %v2938_v59 = vcombine.low %v86_v47, %v90_v49 }
  0x29   :  { %v98_v57 = vld [vmem:[%s4182_s1 + $0x1b8] sm:$0xff]  ;;  %v2952_v1 = vcombine.low %v101_v51, %v105_v52  ;;  %v3335_v10 = vld [vmem:[#allocation2 + $0x44] ss:$16 sps:$4 sm:$0xff]   ;;  %v3345_v21 = vld [vmem:[#allocation2 + $0x80] ss:$16 sps:$4 sm:$0xff]  }
  0x2a   :  { %v102_v60 = vld [vmem:[%s4182_s1 + $0x1d8] sm:$0xff]  ;;  %v2947_v62 = vcombine.high %v94_v55, %v98_v57  ;;  %v3341_v14 = vld [vmem:[#allocation2 + $0x64] ss:$16 sps:$4 sm:$0xff]   ;;  %v3357_v28 = vld [vmem:[#allocation2 + $0xc0] ss:$16 sps:$4 sm:$0xff]  }
  0x2b   :  { %480 = vmatpush1.bf16.msra.mxu0 %v2932_v45  ;;  %521 = vmatpush1.bf16.msra.mxu1 %v2934_v58  ;;  %v2922_v45 = vcombine.low %v70_v32, %v74_v34  ;;  %v2953_v58 = vcombine.high %v101_v51, %v105_v52  ;;  %v3338_v16 = vld [vmem:[#allocation2 + $0x4c] ss:$16 sps:$4 sm:$0xff]   ;;  %v3347_v18 = vld [vmem:[#allocation2 + $0x84] ss:$16 sps:$4 sm:$0xff]   ;;  %v3348_v26 = vld [vmem:[#allocation2 + $0x88] ss:$16 sps:$4 sm:$0xff]  }
  0x2c   :  { %481 = vmatprep.subr.bf16.mxu0 %v2941_v48  ;;  %522 = vmatprep.subr.bf16.mxu1 %v2943_v61  ;;  %v106_v61 = vld [vmem:[%s4182_s1 + $0x1f8] sm:$0xff]  ;;  %v3365_v29 = vld [vmem:[#allocation2 + $0xe4] ss:$16 sps:$4 sm:$0xff]   ;;  %v3363_v32 = vld [vmem:[#allocation2 + $0xe0] ss:$16 sps:$4 sm:$0xff]  }
  0x2d   :  { %v2955_v4 = vcombine.high %v102_v60, %v106_v61  ;;  %v2954_v8 = vcombine.low %v102_v60, %v106_v61  ;;  %v3344_v20 = vld [vmem:[#allocation2 + $0x6c] ss:$16 sps:$4 sm:$0xff]   ;;  %v3360_v34 = vld [vmem:[#allocation2 + $0xc8] ss:$16 sps:$4 sm:$0xff]   ;;  %v3375_v39 = vld [vmem:[#allocation2 + $0x120] ss:$16 sps:$4 sm:$0xff]  }
  0x2e   :  { %v3350_v24 = vld [vmem:[#allocation2 + $0x8c] ss:$16 sps:$4 sm:$0xff]   ;;  %v3372_v41 = vld [vmem:[#allocation2 + $0x108] ss:$16 sps:$4 sm:$0xff]   ;;  %v3393_v51 = vld [vmem:[#allocation2 + $0x180] ss:$16 sps:$4 sm:$0xff]  }
  0x2f   :  { %482 = vmatpush1.bf16.msra.mxu0 %v2940_v54  ;;  %523 = vmatpush1.bf16.msra.mxu1 %v2942_v3  ;;  %v2939_v54 = vcombine.high %v86_v47, %v90_v49  ;;  %v3321_v3 = vld [vmem:[#allocation2] ss:$16 sps:$4 sm:$0xff]   ;;  %v3384_v49 = vld [vmem:[#allocation2 + $0x148] ss:$16 sps:$4 sm:$0xff]   ;;  %v3401_v52 = vld [vmem:[#allocation2 + $0x1a4] ss:$16 sps:$4 sm:$0xff]  }
  0x30   :  { %483 = vmatprep.subr.bf16.mxu0 %v2949_v56  ;;  %524 = vmatprep.subr.bf16.mxu1 %v2951_v7  ;;  %v2944_v56 = vcombine.low %v93_v43, %v97_v44  ;;  %v3326_v7 = vld [vmem:[#allocation2 + $0xc] ss:$16 sps:$4 sm:$0xff]   ;;  %v3381_v43 = vld [vmem:[#allocation2 + $0x140] ss:$16 sps:$4 sm:$0xff]   ;;  %v3389_v44 = vld [vmem:[#allocation2 + $0x164] ss:$16 sps:$4 sm:$0xff]  }
  0x31   :  { %v3387_v47 = vld [vmem:[#allocation2 + $0x160] ss:$16 sps:$4 sm:$0xff]   ;;  %v3410_v61 = vld [vmem:[#allocation2 + $0x1cc] ss:$16 sps:$4 sm:$0xff]  }
  0x32   :  { %v3405_v60 = vld [vmem:[#allocation2 + $0x1c0] ss:$16 sps:$4 sm:$0xff]  }
  0x33   :  { %484 = vmatpush1.bf16.msra.mxu0 %v2948_v63  ;;  %525 = vmatpush1.bf16.msra.mxu1 %v2950_v12  ;;  %v3323_v63 = vld [vmem:[#allocation2 + $0x4] ss:$16 sps:$4 sm:$0xff]   ;;  %v3332_v12 = vld [vmem:[#allocation2 + $0x2c] ss:$16 sps:$4 sm:$0xff]  }
  0x34   :  { %551 = vmatprep.subr.bf16.mxu0 %v2897_v2  ;;  %592 = vmatprep.subr.bf16.mxu1 %v2899_v15  ;;  %v2946_v2 = vcombine.low %v94_v55, %v98_v57  ;;  %v3330_v15 = vld [vmem:[#allocation2 + $0x28] ss:$16 sps:$4 sm:$0xff]   ;;  %v3404_v57 = vld [vmem:[#allocation2 + $0x1ac] ss:$16 sps:$4 sm:$0xff]  }
  0x35   :  { %v3396_v55 = vld [vmem:[#allocation2 + $0x188] ss:$16 sps:$4 sm:$0xff]  }
  0x36   :  { %502 = vmatmul.mubr.bf16.vlgmr.msra.gmra.mrb[0].mxu0 %v3930_v6  ;;  %543 = vmatmul.mubr.bf16.vlgmr.msra.gmra.mrb[0].mxu1 %v3930_v6 }
  0x37   :  { %552 = vmatpush1.bf16.msra.mxu0 %v2896_v9  ;;  %583 = vmatprep.mubr.bf16.mxu0 %v3764_v0  ;;  %v3327_v9 = vld [vmem:[#allocation2 + $0x20] ss:$16 sps:$4 sm:$0xff]  }
  0x38   :  { %553 = vmatprep.subr.bf16.mxu0 %v2905_v11  ;;  %593 = vmatpush1.bf16.msra.mxu1 %v2898_v22  ;;  %v3324_v11 = vld [vmem:[#allocation2 + $0x8] ss:$16 sps:$4 sm:$0xff]   ;;  %v3353_v22 = vld [vmem:[#allocation2 + $0xa4] ss:$16 sps:$4 sm:$0xff]  }
  0x39   :  { %624 = vmatprep.mubr.bf16.mxu1 %v3764_v0  ;;  %594 = vmatprep.subr.bf16.mxu1 %v2907_v23  ;;  %v89_v0 = vld [vmem:[%s4182_s1 + $0x170] sm:$0xff]  ;;  %v3342_v23 = vld [vmem:[#allocation2 + $0x68] ss:$16 sps:$4 sm:$0xff]  }
  0x3a   :  { %v2937_v42 = vcombine.high %v85_v36, %v89_v0  ;;  %v2936_v48 = vcombine.low %v85_v36, %v89_v0  ;;  %v3369_v36 = vld [vmem:[#allocation2 + $0x100] ss:$16 sps:$4 sm:$0xff]   ;;  %v3377_v0 = vld [vmem:[#allocation2 + $0x124] ss:$16 sps:$4 sm:$0xff]  }
  0x3b   :  { %554 = vmatpush1.bf16.msra.mxu0 %v2904_v17  ;;  %v3339_v17 = vld [vmem:[#allocation2 + $0x60] ss:$16 sps:$4 sm:$0xff]  }
  0x3c   :  { %555 = vmatprep.subr.bf16.mxu0 %v2913_v19  ;;  %595 = vmatpush1.bf16.msra.mxu1 %v2906_v30  ;;  %v3336_v19 = vld [vmem:[#allocation2 + $0x48] ss:$16 sps:$4 sm:$0xff]  }
  0x3d   :  { %596 = vmatprep.subr.bf16.mxu1 %v2915_v31  ;;  %v3354_v30 = vld [vmem:[#allocation2 + $0xa8] ss:$16 sps:$4 sm:$0xff]   ;;  %v3362_v31 = vld [vmem:[#allocation2 + $0xcc] ss:$16 sps:$4 sm:$0xff]  }
  0x3f   :  { %556 = vmatpush1.bf16.msra.mxu0 %v2912_v25  ;;  %v3359_v25 = vld [vmem:[#allocation2 + $0xc4] ss:$16 sps:$4 sm:$0xff]  }
  0x40   :  { %557 = vmatprep.subr.bf16.mxu0 %v2921_v27  ;;  %597 = vmatpush1.bf16.msra.mxu1 %v2914_v37  ;;  %v3356_v27 = vld [vmem:[#allocation2 + $0xac] ss:$16 sps:$4 sm:$0xff]   ;;  %v3366_v37 = vld [vmem:[#allocation2 + $0xe8] ss:$16 sps:$4 sm:$0xff]  }
  0x41   :  { %598 = vmatprep.subr.bf16.mxu1 %v2923_v38  ;;  %v3374_v38 = vld [vmem:[#allocation2 + $0x10c] ss:$16 sps:$4 sm:$0xff]  }
  0x43   :  { %558 = vmatpush1.bf16.msra.mxu0 %v2920_v33  ;;  %v3371_v33 = vld [vmem:[#allocation2 + $0x104] ss:$16 sps:$4 sm:$0xff]  }
  0x44   :  { %559 = vmatprep.subr.bf16.mxu0 %v2929_v35  ;;  %599 = vmatpush1.bf16.msra.mxu1 %v2922_v45  ;;  %v3368_v35 = vld [vmem:[#allocation2 + $0xec] ss:$16 sps:$4 sm:$0xff]   ;;  %v3378_v45 = vld [vmem:[#allocation2 + $0x128] ss:$16 sps:$4 sm:$0xff]  }
  0x45   :  { %600 = vmatprep.subr.bf16.mxu1 %v2931_v46  ;;  %v3386_v46 = vld [vmem:[#allocation2 + $0x14c] ss:$16 sps:$4 sm:$0xff]  }
  0x47   :  { %560 = vmatpush1.bf16.msra.mxu0 %v2928_v40  ;;  %v3383_v40 = vld [vmem:[#allocation2 + $0x144] ss:$16 sps:$4 sm:$0xff]  }
  0x48   :  { %561 = vmatprep.subr.bf16.mxu0 %v2937_v42  ;;  %601 = vmatpush1.bf16.msra.mxu1 %v2930_v53  ;;  %v3380_v42 = vld [vmem:[#allocation2 + $0x12c] ss:$16 sps:$4 sm:$0xff]   ;;  %v3390_v53 = vld [vmem:[#allocation2 + $0x168] ss:$16 sps:$4 sm:$0xff]  }
  0x49   :  { %602 = vmatprep.subr.bf16.mxu1 %v2939_v54  ;;  %v3398_v54 = vld [vmem:[#allocation2 + $0x18c] ss:$16 sps:$4 sm:$0xff]  }
  0x4b   :  { %562 = vmatpush1.bf16.msra.mxu0 %v2936_v48  ;;  %v3395_v48 = vld [vmem:[#allocation2 + $0x184] ss:$16 sps:$4 sm:$0xff]  }
  0x4c   :  { %563 = vmatprep.subr.bf16.mxu0 %v2945_v50  ;;  %603 = vmatpush1.bf16.msra.mxu1 %v2938_v59  ;;  %v3392_v50 = vld [vmem:[#allocation2 + $0x16c] ss:$16 sps:$4 sm:$0xff]   ;;  %v3402_v59 = vld [vmem:[#allocation2 + $0x1a8] ss:$16 sps:$4 sm:$0xff]  }
  0x4d   :  { %604 = vmatprep.subr.bf16.mxu1 %v2947_v62  ;;  %v3413_v62 = vld [vmem:[#allocation2 + $0x1e4] ss:$16 sps:$4 sm:$0xff]  }
  0x4f   :  { %564 = vmatpush1.bf16.msra.mxu0 %v2944_v56  ;;  %v3399_v56 = vld [vmem:[#allocation2 + $0x1a0] ss:$16 sps:$4 sm:$0xff]  }
  0x50   :  { %565 = vmatprep.subr.bf16.mxu0 %v2953_v58  ;;  %605 = vmatpush1.bf16.msra.mxu1 %v2946_v2  ;;  %v3407_v58 = vld [vmem:[#allocation2 + $0x1c4] ss:$16 sps:$4 sm:$0xff]   ;;  %v3416_v2 = vld [vmem:[#allocation2 + $0x1ec] ss:$16 sps:$4 sm:$0xff]  }
  0x51   :  { %606 = vmatprep.subr.bf16.mxu1 %v2955_v4  ;;  %v3414_v4 = vld [vmem:[#allocation2 + $0x1e8] ss:$16 sps:$4 sm:$0xff]  }
  0x53   :  { %566 = vmatpush1.bf16.msra.mxu0 %v2952_v1  ;;  %v3411_v1 = vld [vmem:[#allocation2 + $0x1e0] ss:$16 sps:$4 sm:$0xff]  }
  0x54   :  { %2207 = vmatprep.subr.bf16.mxu0 %v3323_v63  ;;  %607 = vmatpush1.bf16.msra.mxu1 %v2954_v8  ;;  %v3408_v63 = vld [vmem:[#allocation2 + $0x1c8] ss:$16 sps:$4 sm:$0xff]  }
  0x55   :  { %2371 = vmatprep.subr.bf16.mxu1 %v3326_v7  ;;  %v109_v7 = vlaneseq }
  0x56   :  { %584 = vmatmul.mubr.bf16.vlgmr.msra.gmra.mrb[4].mxu0 %v3930_v6 }
  0x57   :  { %2208 = vmatpush1.bf16.msra.mxu0 %v3321_v3  ;;  %625 = vmatmul.mubr.bf16.vlgmr.msra.gmra.mrb[4].mxu1 %v3930_v6  ;;  %v3351_v6 = vld [vmem:[#allocation2 + $0xa0] ss:$16 sps:$4 sm:$0xff]   ;;  %v3419_v3 = vld [vmem:[#allocation2 + $0x204] ss:$16 sps:$4 sm:$0xff]   ;;  %v4022_v8 = vshrl.u32 %v109_v7, 7 }
  0x58   :  { %2209 = vmatprep.subr.bf16.mxu0 %v3329_v5  ;;  %2372 = vmatpush1.bf16.msra.mxu1 %v3324_v11  ;;  %v3422_v5 = vld [vmem:[#allocation2 + $0x20c] ss:$16 sps:$4 sm:$0xff]  }
  0x59   :  { %2373 = vmatprep.subr.bf16.mxu1 %v3332_v12  ;;  %v115_v11 = vsub.s32 1, %v4022_v8 }
  0x5b   :  { %2210 = vmatpush1.bf16.msra.mxu0 %v3327_v9  ;;  %v111_v9 = vsub.s32 0, %v4022_v8 }
  0x5c   :  { %2211 = vmatprep.subr.bf16.mxu0 %v3335_v10  ;;  %2374 = vmatpush1.bf16.msra.mxu1 %v3330_v15  ;;  %v4028_v10 = vld [vmem:[%s4183_s2] sm:$0xff]  ;;  %v123_v15 = vsub.s32 3, %v4022_v8 }
  0x5d   :  { %2375 = vmatprep.subr.bf16.mxu1 %v3338_v16  ;;  %v112_v12 = vrot.slane %v4028_v10, %v111_v9 }
  0x5f   :  { %2212 = vmatpush1.bf16.msra.mxu0 %v3333_v13  ;;  %v116_v13 = vrot.slane %v4028_v10, %v115_v11 }
  0x60   :  { %2213 = vmatprep.subr.bf16.mxu0 %v3341_v14  ;;  %2376 = vmatpush1.bf16.msra.mxu1 %v3336_v19 }
  0x61   :  { %2377 = vmatprep.subr.bf16.mxu1 %v3344_v20 }
  0x63   :  { %2214 = vmatpush1.bf16.msra.mxu0 %v3339_v17 }
  0x64   :  { %2215 = vmatprep.subr.bf16.mxu0 %v3347_v18  ;;  %2378 = vmatpush1.bf16.msra.mxu1 %v3342_v23  ;;  %v124_v23 = vrot.slane %v4028_v10, %v123_v15 }
  0x65   :  { %2379 = vmatprep.subr.bf16.mxu1 %v3350_v24 }
  0x67   :  { %2216 = vmatpush1.bf16.msra.mxu0 %v3345_v21 }
  0x68   :  { %2217 = vmatprep.subr.bf16.mxu0 %v3353_v22  ;;  %2380 = vmatpush1.bf16.msra.mxu1 %v3348_v26 }
  0x69   :  { %2381 = vmatprep.subr.bf16.mxu1 %v3356_v27 }
  0x6b   :  { %2218 = vmatpush1.bf16.msra.mxu0 %v3351_v6  ;;  %v3417_v6 = vld [vmem:[#allocation2 + $0x200] ss:$16 sps:$4 sm:$0xff]  }
  0x6c   :  { %2219 = vmatprep.subr.bf16.mxu0 %v3359_v25  ;;  %2382 = vmatpush1.bf16.msra.mxu1 %v3354_v30  ;;  %v3420_v25 = vld [vmem:[#allocation2 + $0x208] ss:$16 sps:$4 sm:$0xff]  }
  0x6d   :  { %2383 = vmatprep.subr.bf16.mxu1 %v3362_v31 }
  0x6f   :  { %2220 = vmatpush1.bf16.msra.mxu0 %v3357_v28  ;;  %v3425_v28 = vld [vmem:[#allocation2 + $0x224] ss:$16 sps:$4 sm:$0xff]  }
  0x70   :  { %2221 = vmatprep.subr.bf16.mxu0 %v3365_v29  ;;  %2384 = vmatpush1.bf16.msra.mxu1 %v3360_v34  ;;  %v3428_v29 = vld [vmem:[#allocation2 + $0x22c] ss:$16 sps:$4 sm:$0xff]   ;;  %v3423_v34 = vld [vmem:[#allocation2 + $0x220] ss:$16 sps:$4 sm:$0xff]  }
  0x71   :  { %2385 = vmatprep.subr.bf16.mxu1 %v3368_v35  ;;  %v3426_v35 = vld [vmem:[#allocation2 + $0x228] ss:$16 sps:$4 sm:$0xff]  }
  0x73   :  { %2222 = vmatpush1.bf16.msra.mxu0 %v3363_v32 }
  0x74   :  { %2223 = vmatprep.subr.bf16.mxu0 %v3371_v33  ;;  %2386 = vmatpush1.bf16.msra.mxu1 %v3366_v37  ;;  %v3434_v37 = vld [vmem:[#allocation2 + $0x24c] ss:$16 sps:$4 sm:$0xff]  }
  0x75   :  { %2387 = vmatprep.subr.bf16.mxu1 %v3374_v38 }
  0x77   :  { %2224 = vmatpush1.bf16.msra.mxu0 %v3369_v36 }
  0x78   :  { %2225 = vmatprep.subr.bf16.mxu0 %v3377_v0  ;;  %2388 = vmatpush1.bf16.msra.mxu1 %v3372_v41  ;;  %v3431_v0 = vld [vmem:[#allocation2 + $0x244] ss:$16 sps:$4 sm:$0xff]  }
  0x79   :  { %2389 = vmatprep.subr.bf16.mxu1 %v3380_v42  ;;  %v3437_v41 = vld [vmem:[#allocation2 + $0x264] ss:$16 sps:$4 sm:$0xff]   ;;  %v3440_v42 = vld [vmem:[#allocation2 + $0x26c] ss:$16 sps:$4 sm:$0xff]  }
  0x7b   :  { %2226 = vmatpush1.bf16.msra.mxu0 %v3375_v39  ;;  %v3429_v39 = vld [vmem:[#allocation2 + $0x240] ss:$16 sps:$4 sm:$0xff]  }
  0x7c   :  { %2227 = vmatprep.subr.bf16.mxu0 %v3383_v40  ;;  %2390 = vmatpush1.bf16.msra.mxu1 %v3378_v45  ;;  %v3432_v40 = vld [vmem:[#allocation2 + $0x248] ss:$16 sps:$4 sm:$0xff]   ;;  %v3443_v45 = vld [vmem:[#allocation2 + $0x284] ss:$16 sps:$4 sm:$0xff]  }
  0x7d   :  { %2391 = vmatprep.subr.bf16.mxu1 %v3386_v46  ;;  %v3446_v46 = vld [vmem:[#allocation2 + $0x28c] ss:$16 sps:$4 sm:$0xff]  }
  0x7f   :  { %2228 = vmatpush1.bf16.msra.mxu0 %v3381_v43  ;;  %v3435_v43 = vld [vmem:[#allocation2 + $0x260] ss:$16 sps:$4 sm:$0xff]  }
  0x80   :  { %2229 = vmatprep.subr.bf16.mxu0 %v3389_v44  ;;  %2392 = vmatpush1.bf16.msra.mxu1 %v3384_v49  ;;  %v3438_v44 = vld [vmem:[#allocation2 + $0x268] ss:$16 sps:$4 sm:$0xff]   ;;  %v3449_v49 = vld [vmem:[#allocation2 + $0x2a4] ss:$16 sps:$4 sm:$0xff]  }
  0x81   :  { %2393 = vmatprep.subr.bf16.mxu1 %v3392_v50  ;;  %v3452_v50 = vld [vmem:[#allocation2 + $0x2ac] ss:$16 sps:$4 sm:$0xff]  }
  0x83   :  { %2230 = vmatpush1.bf16.msra.mxu0 %v3387_v47  ;;  %v3441_v47 = vld [vmem:[#allocation2 + $0x280] ss:$16 sps:$4 sm:$0xff]  }
  0x84   :  { %2231 = vmatprep.subr.bf16.mxu0 %v3395_v48  ;;  %2394 = vmatpush1.bf16.msra.mxu1 %v3390_v53  ;;  %v3444_v48 = vld [vmem:[#allocation2 + $0x288] ss:$16 sps:$4 sm:$0xff]   ;;  %v3455_v53 = vld [vmem:[#allocation2 + $0x2c4] ss:$16 sps:$4 sm:$0xff]  }
  0x85   :  { %2395 = vmatprep.subr.bf16.mxu1 %v3398_v54  ;;  %v3458_v54 = vld [vmem:[#allocation2 + $0x2cc] ss:$16 sps:$4 sm:$0xff]  }
  0x87   :  { %2232 = vmatpush1.bf16.msra.mxu0 %v3393_v51  ;;  %v3447_v51 = vld [vmem:[#allocation2 + $0x2a0] ss:$16 sps:$4 sm:$0xff]  }
  0x88   :  { %2233 = vmatprep.subr.bf16.mxu0 %v3401_v52  ;;  %2396 = vmatpush1.bf16.msra.mxu1 %v3396_v55  ;;  %v3450_v52 = vld [vmem:[#allocation2 + $0x2a8] ss:$16 sps:$4 sm:$0xff]   ;;  %v3453_v55 = vld [vmem:[#allocation2 + $0x2c0] ss:$16 sps:$4 sm:$0xff]  }
  0x89   :  { %2397 = vmatprep.subr.bf16.mxu1 %v3404_v57  ;;  %v3461_v57 = vld [vmem:[#allocation2 + $0x2e4] ss:$16 sps:$4 sm:$0xff]  }
  0x8b   :  { %2234 = vmatpush1.bf16.msra.mxu0 %v3399_v56  ;;  %v3456_v56 = vld [vmem:[#allocation2 + $0x2c8] ss:$16 sps:$4 sm:$0xff]  }
  0x8c   :  { %2235 = vmatprep.subr.bf16.mxu0 %v3407_v58  ;;  %2398 = vmatpush1.bf16.msra.mxu1 %v3402_v59  ;;  %v3464_v58 = vld [vmem:[#allocation2 + $0x2ec] ss:$16 sps:$4 sm:$0xff]  }
  0x8d   :  { %2399 = vmatprep.subr.bf16.mxu1 %v3410_v61  ;;  %v3459_v61 = vld [vmem:[#allocation2 + $0x2e0] ss:$16 sps:$4 sm:$0xff]  }
  0x8f   :  { %2236 = vmatpush1.bf16.msra.mxu0 %v3405_v60 }
  0x90   :  { %2237 = vmatprep.subr.bf16.mxu0 %v3413_v62  ;;  %2400 = vmatpush1.bf16.msra.mxu1 %v3408_v63  ;;  %v3462_v62 = vld [vmem:[#allocation2 + $0x2e8] ss:$16 sps:$4 sm:$0xff]  }
  0x91   :  { %2401 = vmatprep.subr.bf16.mxu1 %v3416_v2  ;;  %v3470_v2 = vld [vmem:[#allocation2 + $0x30c] ss:$16 sps:$4 sm:$0xff]  }
  0x93   :  { %2238 = vmatpush1.bf16.msra.mxu0 %v3411_v1  ;;  %v3467_v1 = vld [vmem:[#allocation2 + $0x304] ss:$16 sps:$4 sm:$0xff]  }
  0x94   :  { %2248 = vmatprep.subr.bf16.mxu0 %v3419_v3  ;;  %2402 = vmatpush1.bf16.msra.mxu1 %v3414_v4  ;;  %v3465_v4 = vld [vmem:[#allocation2 + $0x300] ss:$16 sps:$4 sm:$0xff]  }
  0x95   :  { %2412 = vmatprep.subr.bf16.mxu1 %v3422_v5  ;;  %v3468_v5 = vld [vmem:[#allocation2 + $0x308] ss:$16 sps:$4 sm:$0xff]  }
 0x109   :  { %v503_v14 = vpop.f32.mrb[0].mxu0  ;;  %v4041_v26 = vpop.f32.mrb[0].mxu1 }
 0x10a   :  { %v504_v16 = vadd.f32 %v503_v14, %v112_v12  ;;  %v505_v17 = vpop.f32.mrb[1].mxu0  ;;  %v546_v30 = vpop.f32.mrb[1].mxu1  ;;  %v3473_v12 = vld [vmem:[#allocation2 + $0x324] ss:$16 sps:$4 sm:$0xff]  }
 0x10b   :  { %v506_v18 = vadd.f32 %v505_v17, %v116_v13  ;;  %v507_v19 = vpop.f32.mrb[2].mxu0  ;;  %v547_v31 = vadd.f32 %v546_v30, %v124_v23  ;;  %v548_v32 = vpop.f32.mrb[2].mxu1  ;;  %v3476_v13 = vld [vmem:[#allocation2 + $0x32c] ss:$16 sps:$4 sm:$0xff]   ;;  %v3480_v23 = vld [vmem:[#allocation2 + $0x348] ss:$16 sps:$4 sm:$0xff]  }
 0x10c   :  { %v633_v20 = vmax.f32 %v504_v16, 0.0  ;;  %v508_v21 = vpop.f32.mrb[3].mxu0  ;;  %v549_v33 = vpop.f32.mrb[3].mxu1  ;;  %v3474_v19 = vld [vmem:[#allocation2 + $0x328] ss:$16 sps:$4 sm:$0xff]   ;;  %v119_v30 = vsub.s32 2, %v4022_v8 }
 0x10d   :  { %v634_v22 = vmax.f32 %v506_v18, 0.0  ;;  %v636_v36 = vmax.f32 %v547_v31, 0.0  ;;  %v3471_v18 = vld [vmem:[#allocation2 + $0x320] ss:$16 sps:$4 sm:$0xff]   ;;  %v3482_v21 = vld [vmem:[#allocation2 + $0x34c] ss:$16 sps:$4 sm:$0xff]  }
 0x10e   :  { %v641_v27 = vpack.c.bf16 %v633_v20, %v633_v20  ;;  %v3479_v20 = vld [vmem:[#allocation2 + $0x344] ss:$16 sps:$4 sm:$0xff]   ;;  %v3489_v31 = vld [vmem:[#allocation2 + $0x380] ss:$16 sps:$4 sm:$0xff]   ;;  %v3492_v32 = vld [vmem:[#allocation2 + $0x388] ss:$16 sps:$4 sm:$0xff]  }
 0x10f   :  { %v642_v24 = vpack.c.bf16 %v634_v22, %v634_v22  ;;  %v644_v38 = vpack.c.bf16 %v636_v36, %v636_v36  ;;  %v3477_v22 = vld [vmem:[#allocation2 + $0x340] ss:$16 sps:$4 sm:$0xff]   ;;  %v3497_v33 = vld [vmem:[#allocation2 + $0x3a4] ss:$16 sps:$4 sm:$0xff]   ;;  %v120_v36 = vrot.slane %v4028_v10, %v119_v30 }
 0x111   :  { %2239 = vmatprep.mubr.bf16.mxu0 %v642_v24  ;;  %2403 = vmatprep.mubr.bf16.mxu1 %v642_v24  ;;  %v3485_v24 = vld [vmem:[#allocation2 + $0x364] ss:$16 sps:$4 sm:$0xff]  }
 0x112   :  { %2240 = vmatmul.mubr.bf16.vlgmr.msra.gmra.mrb[8].mxu0 %v641_v27  ;;  %2404 = vmatmul.mubr.bf16.vlgmr.msra.gmra.mrb[8].mxu1 %v641_v27  ;;  %v3486_v27 = vld [vmem:[#allocation2 + $0x368] ss:$16 sps:$4 sm:$0xff]  }
 0x113   :  { %2249 = vmatpush1.bf16.msra.mxu0 %v3417_v6  ;;  %2413 = vmatpush1.bf16.msra.mxu1 %v3420_v25  ;;  %v3488_v6 = vld [vmem:[#allocation2 + $0x36c] ss:$16 sps:$4 sm:$0xff]   ;;  %v3483_v25 = vld [vmem:[#allocation2 + $0x360] ss:$16 sps:$4 sm:$0xff]  }
 0x114   :  { %2250 = vmatprep.subr.bf16.mxu0 %v3425_v28  ;;  %2414 = vmatprep.subr.bf16.mxu1 %v3428_v29  ;;  %v3491_v28 = vld [vmem:[#allocation2 + $0x384] ss:$16 sps:$4 sm:$0xff]   ;;  %v3494_v29 = vld [vmem:[#allocation2 + $0x38c] ss:$16 sps:$4 sm:$0xff]  }
 0x115   :  { %2280 = vmatprep.mubr.bf16.mxu0 %v644_v38  ;;  %2444 = vmatprep.mubr.bf16.mxu1 %v644_v38  ;;  %v3503_v38 = vld [vmem:[#allocation2 + $0x3c4] ss:$16 sps:$4 sm:$0xff]  }
 0x117   :  { %2251 = vmatpush1.bf16.msra.mxu0 %v3423_v34  ;;  %2415 = vmatpush1.bf16.msra.mxu1 %v3426_v35  ;;  %v3500_v34 = vld [vmem:[#allocation2 + $0x3ac] ss:$16 sps:$4 sm:$0xff]   ;;  %v131_v35 = vsub.s32 5, %v4022_v8 }
 0x118   :  { %2252 = vmatprep.subr.bf16.mxu0 %v3431_v0  ;;  %2416 = vmatprep.subr.bf16.mxu1 %v3434_v37  ;;  %v3495_v0 = vld [vmem:[#allocation2 + $0x3a0] ss:$16 sps:$4 sm:$0xff]   ;;  %v3498_v37 = vld [vmem:[#allocation2 + $0x3a8] ss:$16 sps:$4 sm:$0xff]  }
 0x11b   :  { %2253 = vmatpush1.bf16.msra.mxu0 %v3429_v39  ;;  %2417 = vmatpush1.bf16.msra.mxu1 %v3432_v40  ;;  %v3506_v39 = vld [vmem:[#allocation2 + $0x3cc] ss:$16 sps:$4 sm:$0xff]   ;;  %v132_v40 = vrot.slane %v4028_v10, %v131_v35  ;;  %v3569_v35 = vld [vmem:[#allocation2 + $0x524] ss:$16 sps:$4 sm:$0xff]  }
 0x11c   :  { %2254 = vmatprep.subr.bf16.mxu0 %v3437_v41  ;;  %2418 = vmatprep.subr.bf16.mxu1 %v3440_v42  ;;  %v545_v41 = vadd.f32 %v4041_v26, %v120_v36  ;;  %v3501_v42 = vld [vmem:[#allocation2 + $0x3c0] ss:$16 sps:$4 sm:$0xff]   ;;  %v3572_v36 = vld [vmem:[#allocation2 + $0x52c] ss:$16 sps:$4 sm:$0xff]  }
 0x11f   :  { %2255 = vmatpush1.bf16.msra.mxu0 %v3435_v43  ;;  %2419 = vmatpush1.bf16.msra.mxu1 %v3438_v44  ;;  %v3504_v43 = vld [vmem:[#allocation2 + $0x3c8] ss:$16 sps:$4 sm:$0xff]   ;;  %v3509_v44 = vld [vmem:[#allocation2 + $0x3e4] ss:$16 sps:$4 sm:$0xff]  }
 0x120   :  { %2256 = vmatprep.subr.bf16.mxu0 %v3443_v45  ;;  %2420 = vmatprep.subr.bf16.mxu1 %v3446_v46  ;;  %v3512_v45 = vld [vmem:[#allocation2 + $0x3ec] ss:$16 sps:$4 sm:$0xff]  }
 0x123   :  { %2257 = vmatpush1.bf16.msra.mxu0 %v3441_v47  ;;  %2421 = vmatpush1.bf16.msra.mxu1 %v3444_v48  ;;  %v635_v47 = vmax.f32 %v545_v41, 0.0  ;;  %v3507_v48 = vld [vmem:[#allocation2 + $0x3e0] ss:$16 sps:$4 sm:$0xff]   ;;  %v3576_v41 = vld [vmem:[#allocation2 + $0x548] ss:$16 sps:$4 sm:$0xff]  }
 0x124   :  { %2258 = vmatprep.subr.bf16.mxu0 %v3449_v49  ;;  %2422 = vmatprep.subr.bf16.mxu1 %v3452_v50  ;;  %v3510_v49 = vld [vmem:[#allocation2 + $0x3e8] ss:$16 sps:$4 sm:$0xff]   ;;  %v3515_v50 = vld [vmem:[#allocation2 + $0x404] ss:$16 sps:$4 sm:$0xff]  }
 0x127   :  { %2259 = vmatpush1.bf16.msra.mxu0 %v3447_v51  ;;  %2423 = vmatpush1.bf16.msra.mxu1 %v3450_v52  ;;  %v3518_v51 = vld [vmem:[#allocation2 + $0x40c] ss:$16 sps:$4 sm:$0xff]   ;;  %v643_v52 = vpack.c.bf16 %v635_v47, %v635_v47 }
 0x128   :  { %2260 = vmatprep.subr.bf16.mxu0 %v3455_v53  ;;  %2424 = vmatprep.subr.bf16.mxu1 %v3458_v54  ;;  %v3513_v53 = vld [vmem:[#allocation2 + $0x400] ss:$16 sps:$4 sm:$0xff]   ;;  %v3516_v54 = vld [vmem:[#allocation2 + $0x408] ss:$16 sps:$4 sm:$0xff]   ;;  %v3590_v47 = vld [vmem:[#allocation2 + $0x58c] ss:$16 sps:$4 sm:$0xff]  }
 0x129   :  { %v4043_v59 = vpop.f32.mrb[4].mxu0 }
 0x12a   :  { %v4045_v60 = vpop.f32.mrb[5].mxu0  ;;  %v4047_v7 = vpop.f32.mrb[4].mxu1 }
 0x12b   :  { %2261 = vmatpush1.bf16.msra.mxu0 %v3453_v55  ;;  %2425 = vmatpush1.bf16.msra.mxu1 %v3456_v56  ;;  %v589_v63 = vpop.f32.mrb[6].mxu0  ;;  %v4049_v14 = vpop.f32.mrb[5].mxu1  ;;  %v588_v46 = vadd.f32 %v4045_v60, %v132_v40  ;;  %v3521_v55 = vld [vmem:[#allocation2 + $0x424] ss:$16 sps:$4 sm:$0xff]   ;;  %v3524_v56 = vld [vmem:[#allocation2 + $0x42c] ss:$16 sps:$4 sm:$0xff]  }
 0x12c   :  { %2262 = vmatprep.subr.bf16.mxu0 %v3461_v57  ;;  %2426 = vmatprep.subr.bf16.mxu1 %v3464_v58  ;;  %v590_v3 = vpop.f32.mrb[7].mxu0  ;;  %v630_v16 = vpop.f32.mrb[6].mxu1  ;;  %v3519_v58 = vld [vmem:[#allocation2 + $0x420] ss:$16 sps:$4 sm:$0xff]   ;;  %v3522_v60 = vld [vmem:[#allocation2 + $0x428] ss:$16 sps:$4 sm:$0xff]  }
 0x12d   :  { %v631_v17 = vpop.f32.mrb[7].mxu1  ;;  %v638_v26 = vmax.f32 %v588_v46, 0.0  ;;  %v3525_v63 = vld [vmem:[#allocation2 + $0x440] ss:$16 sps:$4 sm:$0xff]   ;;  %v3536_v3 = vld [vmem:[#allocation2 + $0x46c] ss:$16 sps:$4 sm:$0xff]  }
 0x12e   :  { %v3537_v16 = vld [vmem:[#allocation2 + $0x480] ss:$16 sps:$4 sm:$0xff]   ;;  %v3540_v17 = vld [vmem:[#allocation2 + $0x488] ss:$16 sps:$4 sm:$0xff]   ;;  %v3587_v46 = vld [vmem:[#allocation2 + $0x584] ss:$16 sps:$4 sm:$0xff]  }
 0x12f   :  { %2263 = vmatpush1.bf16.msra.mxu0 %v3459_v61  ;;  %2427 = vmatpush1.bf16.msra.mxu1 %v3462_v62  ;;  %v646_v57 = vpack.c.bf16 %v638_v26, %v638_v26  ;;  %v3527_v61 = vld [vmem:[#allocation2 + $0x444] ss:$16 sps:$4 sm:$0xff]   ;;  %v3530_v62 = vld [vmem:[#allocation2 + $0x44c] ss:$16 sps:$4 sm:$0xff]   ;;  %v3573_v40 = vld [vmem:[#allocation2 + $0x540] ss:$16 sps:$4 sm:$0xff]  }
 0x130   :  { %2264 = vmatprep.subr.bf16.mxu0 %v3467_v1  ;;  %2428 = vmatprep.subr.bf16.mxu1 %v3470_v2  ;;  %v3528_v1 = vld [vmem:[#allocation2 + $0x448] ss:$16 sps:$4 sm:$0xff]   ;;  %v3533_v2 = vld [vmem:[#allocation2 + $0x464] ss:$16 sps:$4 sm:$0xff]   ;;  %v3596_v26 = vld [vmem:[#allocation2 + $0x5ac] ss:$16 sps:$4 sm:$0xff]  }
 0x133   :  { %2265 = vmatpush1.bf16.msra.mxu0 %v3465_v4  ;;  %2429 = vmatpush1.bf16.msra.mxu1 %v3468_v5  ;;  %v3531_v4 = vld [vmem:[#allocation2 + $0x460] ss:$16 sps:$4 sm:$0xff]   ;;  %v3534_v5 = vld [vmem:[#allocation2 + $0x468] ss:$16 sps:$4 sm:$0xff]  }
 0x134   :  { %2266 = vmatprep.subr.bf16.mxu0 %v3473_v12  ;;  %2430 = vmatprep.subr.bf16.mxu1 %v3476_v13  ;;  %v3539_v12 = vld [vmem:[#allocation2 + $0x484] ss:$16 sps:$4 sm:$0xff]   ;;  %v3542_v13 = vld [vmem:[#allocation2 + $0x48c] ss:$16 sps:$4 sm:$0xff]  }
 0x137   :  { %2267 = vmatpush1.bf16.msra.mxu0 %v3471_v18  ;;  %2431 = vmatpush1.bf16.msra.mxu1 %v3474_v19  ;;  %v3545_v18 = vld [vmem:[#allocation2 + $0x4a4] ss:$16 sps:$4 sm:$0xff]   ;;  %v3548_v19 = vld [vmem:[#allocation2 + $0x4ac] ss:$16 sps:$4 sm:$0xff]  }
 0x138   :  { %2268 = vmatprep.subr.bf16.mxu0 %v3479_v20  ;;  %2432 = vmatprep.subr.bf16.mxu1 %v3482_v21  ;;  %v3543_v20 = vld [vmem:[#allocation2 + $0x4a0] ss:$16 sps:$4 sm:$0xff]   ;;  %v3546_v21 = vld [vmem:[#allocation2 + $0x4a8] ss:$16 sps:$4 sm:$0xff]  }
 0x13b   :  { %2269 = vmatpush1.bf16.msra.mxu0 %v3477_v22  ;;  %2433 = vmatpush1.bf16.msra.mxu1 %v3480_v23  ;;  %v3551_v22 = vld [vmem:[#allocation2 + $0x4c4] ss:$16 sps:$4 sm:$0xff]   ;;  %v3554_v23 = vld [vmem:[#allocation2 + $0x4cc] ss:$16 sps:$4 sm:$0xff]  }
 0x13c   :  { %2270 = vmatprep.subr.bf16.mxu0 %v3485_v24  ;;  %2434 = vmatprep.subr.bf16.mxu1 %v3488_v6  ;;  %v3549_v24 = vld [vmem:[#allocation2 + $0x4c0] ss:$16 sps:$4 sm:$0xff]   ;;  %v3552_v6 = vld [vmem:[#allocation2 + $0x4c8] ss:$16 sps:$4 sm:$0xff]  }
 0x13f   :  { %2271 = vmatpush1.bf16.msra.mxu0 %v3483_v25  ;;  %2435 = vmatpush1.bf16.msra.mxu1 %v3486_v27  ;;  %v3557_v25 = vld [vmem:[#allocation2 + $0x4e4] ss:$16 sps:$4 sm:$0xff]   ;;  %v3560_v27 = vld [vmem:[#allocation2 + $0x4ec] ss:$16 sps:$4 sm:$0xff]  }
 0x140   :  { %2272 = vmatprep.subr.bf16.mxu0 %v3491_v28  ;;  %2436 = vmatprep.subr.bf16.mxu1 %v3494_v29  ;;  %v3555_v28 = vld [vmem:[#allocation2 + $0x4e0] ss:$16 sps:$4 sm:$0xff]   ;;  %v3558_v29 = vld [vmem:[#allocation2 + $0x4e8] ss:$16 sps:$4 sm:$0xff]  }
 0x143   :  { %2273 = vmatpush1.bf16.msra.mxu0 %v3489_v31  ;;  %2437 = vmatpush1.bf16.msra.mxu1 %v3492_v32  ;;  %v3563_v31 = vld [vmem:[#allocation2 + $0x504] ss:$16 sps:$4 sm:$0xff]   ;;  %v3566_v32 = vld [vmem:[#allocation2 + $0x50c] ss:$16 sps:$4 sm:$0xff]  }
 0x144   :  { %2274 = vmatprep.subr.bf16.mxu0 %v3497_v33  ;;  %2438 = vmatprep.subr.bf16.mxu1 %v3500_v34  ;;  %v3561_v33 = vld [vmem:[#allocation2 + $0x500] ss:$16 sps:$4 sm:$0xff]   ;;  %v3564_v34 = vld [vmem:[#allocation2 + $0x508] ss:$16 sps:$4 sm:$0xff]  }
 0x147   :  { %2275 = vmatpush1.bf16.msra.mxu0 %v3495_v0  ;;  %2439 = vmatpush1.bf16.msra.mxu1 %v3498_v37  ;;  %v3567_v0 = vld [vmem:[#allocation2 + $0x520] ss:$16 sps:$4 sm:$0xff]   ;;  %v3570_v37 = vld [vmem:[#allocation2 + $0x528] ss:$16 sps:$4 sm:$0xff]  }
 0x148   :  { %2276 = vmatprep.subr.bf16.mxu0 %v3503_v38  ;;  %2440 = vmatprep.subr.bf16.mxu1 %v3506_v39  ;;  %v3575_v38 = vld [vmem:[#allocation2 + $0x544] ss:$16 sps:$4 sm:$0xff]   ;;  %v3578_v39 = vld [vmem:[#allocation2 + $0x54c] ss:$16 sps:$4 sm:$0xff]  }
 0x14b   :  { %2277 = vmatpush1.bf16.msra.mxu0 %v3501_v42  ;;  %2441 = vmatpush1.bf16.msra.mxu1 %v3504_v43  ;;  %v3581_v42 = vld [vmem:[#allocation2 + $0x564] ss:$16 sps:$4 sm:$0xff]   ;;  %v3584_v43 = vld [vmem:[#allocation2 + $0x56c] ss:$16 sps:$4 sm:$0xff]  }
 0x14c   :  { %2278 = vmatprep.subr.bf16.mxu0 %v3509_v44  ;;  %2442 = vmatprep.subr.bf16.mxu1 %v3512_v45  ;;  %v3579_v44 = vld [vmem:[#allocation2 + $0x560] ss:$16 sps:$4 sm:$0xff]   ;;  %v3582_v45 = vld [vmem:[#allocation2 + $0x568] ss:$16 sps:$4 sm:$0xff]  }
 0x14f   :  { %2279 = vmatpush1.bf16.msra.mxu0 %v3507_v48  ;;  %2443 = vmatpush1.bf16.msra.mxu1 %v3510_v49  ;;  %v127_v48 = vsub.s32 4, %v4022_v8  ;;  %v3585_v49 = vld [vmem:[#allocation2 + $0x580] ss:$16 sps:$4 sm:$0xff]  }
 0x150   :  { %2289 = vmatprep.subr.bf16.mxu0 %v3515_v50  ;;  %2453 = vmatprep.subr.bf16.mxu1 %v3518_v51  ;;  %v3588_v50 = vld [vmem:[#allocation2 + $0x588] ss:$16 sps:$4 sm:$0xff]   ;;  %v3593_v51 = vld [vmem:[#allocation2 + $0x5a4] ss:$16 sps:$4 sm:$0xff]  }
 0x152   :  { %2281 = vmatmul.mubr.bf16.vlgmr.msra.gmra.mrb[8].mxu0 %v643_v52  ;;  %2445 = vmatmul.mubr.bf16.vlgmr.msra.gmra.mrb[8].mxu1 %v643_v52  ;;  %v139_v52 = vsub.s32 7, %v4022_v8 }
 0x153   :  { %2290 = vmatpush1.bf16.msra.mxu0 %v3513_v53  ;;  %2454 = vmatpush1.bf16.msra.mxu1 %v3516_v54  ;;  %v128_v53 = vrot.slane %v4028_v10, %v127_v48  ;;  %v3591_v54 = vld [vmem:[#allocation2 + $0x5a0] ss:$16 sps:$4 sm:$0xff]   ;;  %v3662_v48 = vld [vmem:[#allocation2 + $0x70c] ss:$16 sps:$4 sm:$0xff]  }
 0x154   :  { %2291 = vmatprep.subr.bf16.mxu0 %v3521_v55  ;;  %2455 = vmatprep.subr.bf16.mxu1 %v3524_v56  ;;  %v3594_v55 = vld [vmem:[#allocation2 + $0x5a8] ss:$16 sps:$4 sm:$0xff]   ;;  %v3599_v56 = vld [vmem:[#allocation2 + $0x5c4] ss:$16 sps:$4 sm:$0xff]  }
 0x155   :  { %2321 = vmatprep.mubr.bf16.mxu0 %v646_v57  ;;  %2485 = vmatprep.mubr.bf16.mxu1 %v646_v57  ;;  %v3602_v57 = vld [vmem:[#allocation2 + $0x5cc] ss:$16 sps:$4 sm:$0xff]  }
 0x157   :  { %2292 = vmatpush1.bf16.msra.mxu0 %v3519_v58  ;;  %2456 = vmatpush1.bf16.msra.mxu1 %v3522_v60  ;;  %v140_v58 = vrot.slane %v4028_v10, %v139_v52  ;;  %v586_v60 = vadd.f32 %v4043_v59, %v128_v53  ;;  %v3663_v52 = vld [vmem:[#allocation2 + $0x720] ss:$16 sps:$4 sm:$0xff]   ;;  %v3666_v53 = vld [vmem:[#allocation2 + $0x728] ss:$16 sps:$4 sm:$0xff]  }
 0x158   :  { %2293 = vmatprep.subr.bf16.mxu0 %v3527_v61  ;;  %2457 = vmatprep.subr.bf16.mxu1 %v3530_v62  ;;  %v3597_v61 = vld [vmem:[#allocation2 + $0x5c0] ss:$16 sps:$4 sm:$0xff]   ;;  %v3600_v62 = vld [vmem:[#allocation2 + $0x5c8] ss:$16 sps:$4 sm:$0xff]  }
 0x15b   :  { %2294 = vmatpush1.bf16.msra.mxu0 %v3525_v63  ;;  %2458 = vmatpush1.bf16.msra.mxu1 %v3528_v1  ;;  %v3605_v63 = vld [vmem:[#allocation2 + $0x5e4] ss:$16 sps:$4 sm:$0xff]   ;;  %v3608_v1 = vld [vmem:[#allocation2 + $0x5ec] ss:$16 sps:$4 sm:$0xff]  }
 0x15c   :  { %2295 = vmatprep.subr.bf16.mxu0 %v3533_v2  ;;  %2459 = vmatprep.subr.bf16.mxu1 %v3536_v3  ;;  %v629_v2 = vadd.f32 %v4049_v14, %v140_v58  ;;  %v637_v3 = vmax.f32 %v586_v60, 0.0  ;;  %v3677_v58 = vld [vmem:[#allocation2 + $0x764] ss:$16 sps:$4 sm:$0xff]   ;;  %v3680_v60 = vld [vmem:[#allocation2 + $0x76c] ss:$16 sps:$4 sm:$0xff]  }
 0x15e   :  { %v640_v59 = vmax.f32 %v629_v2, 0.0  ;;  %v3681_v2 = vld [vmem:[#allocation2 + $0x780] ss:$16 sps:$4 sm:$0xff]  }
 0x15f   :  { %2296 = vmatpush1.bf16.msra.mxu0 %v3531_v4  ;;  %2460 = vmatpush1.bf16.msra.mxu1 %v3534_v5  ;;  %v3603_v4 = vld [vmem:[#allocation2 + $0x5e0] ss:$16 sps:$4 sm:$0xff]   ;;  %v3606_v5 = vld [vmem:[#allocation2 + $0x5e8] ss:$16 sps:$4 sm:$0xff]  }
 0x160   :  { %2297 = vmatprep.subr.bf16.mxu0 %v3539_v12  ;;  %2461 = vmatprep.subr.bf16.mxu1 %v3542_v13  ;;  %v3611_v12 = vld [vmem:[#allocation2 + $0x604] ss:$16 sps:$4 sm:$0xff]   ;;  %v3614_v13 = vld [vmem:[#allocation2 + $0x60c] ss:$16 sps:$4 sm:$0xff]   ;;  %v648_v14 = vpack.c.bf16 %v640_v59, %v640_v59  ;;  %v3690_v59 = vld [vmem:[#allocation2 + $0x7a8] ss:$16 sps:$4 sm:$0xff]  }
 0x163   :  { %2298 = vmatpush1.bf16.msra.mxu0 %v3537_v16  ;;  %2462 = vmatpush1.bf16.msra.mxu1 %v3540_v17  ;;  %v645_v16 = vpack.c.bf16 %v637_v3, %v637_v3  ;;  %v3609_v17 = vld [vmem:[#allocation2 + $0x600] ss:$16 sps:$4 sm:$0xff]   ;;  %v3684_v3 = vld [vmem:[#allocation2 + $0x788] ss:$16 sps:$4 sm:$0xff]  }
 0x164   :  { %2299 = vmatprep.subr.bf16.mxu0 %v3545_v18  ;;  %2463 = vmatprep.subr.bf16.mxu1 %v3548_v19  ;;  %v3612_v18 = vld [vmem:[#allocation2 + $0x608] ss:$16 sps:$4 sm:$0xff]   ;;  %v3617_v19 = vld [vmem:[#allocation2 + $0x624] ss:$16 sps:$4 sm:$0xff]  }
 0x167   :  { %2300 = vmatpush1.bf16.msra.mxu0 %v3543_v20  ;;  %2464 = vmatpush1.bf16.msra.mxu1 %v3546_v21  ;;  %v3620_v20 = vld [vmem:[#allocation2 + $0x62c] ss:$16 sps:$4 sm:$0xff]   ;;  %v3615_v21 = vld [vmem:[#allocation2 + $0x620] ss:$16 sps:$4 sm:$0xff]  }
 0x168   :  { %2301 = vmatprep.subr.bf16.mxu0 %v3551_v22  ;;  %2465 = vmatprep.subr.bf16.mxu1 %v3554_v23  ;;  %v3618_v22 = vld [vmem:[#allocation2 + $0x628] ss:$16 sps:$4 sm:$0xff]   ;;  %v3623_v23 = vld [vmem:[#allocation2 + $0x644] ss:$16 sps:$4 sm:$0xff]  }
 0x16b   :  { %2302 = vmatpush1.bf16.msra.mxu0 %v3549_v24  ;;  %2466 = vmatpush1.bf16.msra.mxu1 %v3552_v6  ;;  %v3626_v24 = vld [vmem:[#allocation2 + $0x64c] ss:$16 sps:$4 sm:$0xff]   ;;  %v3621_v6 = vld [vmem:[#allocation2 + $0x640] ss:$16 sps:$4 sm:$0xff]  }
 0x16c   :  { %2303 = vmatprep.subr.bf16.mxu0 %v3557_v25  ;;  %2467 = vmatprep.subr.bf16.mxu1 %v3560_v27  ;;  %v3624_v25 = vld [vmem:[#allocation2 + $0x648] ss:$16 sps:$4 sm:$0xff]   ;;  %v3629_v27 = vld [vmem:[#allocation2 + $0x664] ss:$16 sps:$4 sm:$0xff]  }
 0x16f   :  { %2304 = vmatpush1.bf16.msra.mxu0 %v3555_v28  ;;  %2468 = vmatpush1.bf16.msra.mxu1 %v3558_v29  ;;  %v3632_v28 = vld [vmem:[#allocation2 + $0x66c] ss:$16 sps:$4 sm:$0xff]   ;;  %v3627_v29 = vld [vmem:[#allocation2 + $0x660] ss:$16 sps:$4 sm:$0xff]  }
 0x170   :  { %2305 = vmatprep.subr.bf16.mxu0 %v3563_v31  ;;  %2469 = vmatprep.subr.bf16.mxu1 %v3566_v32  ;;  %v3630_v31 = vld [vmem:[#allocation2 + $0x668] ss:$16 sps:$4 sm:$0xff]   ;;  %v3635_v32 = vld [vmem:[#allocation2 + $0x684] ss:$16 sps:$4 sm:$0xff]  }
 0x173   :  { %2306 = vmatpush1.bf16.msra.mxu0 %v3561_v33  ;;  %2470 = vmatpush1.bf16.msra.mxu1 %v3564_v34  ;;  %v3638_v33 = vld [vmem:[#allocation2 + $0x68c] ss:$16 sps:$4 sm:$0xff]   ;;  %v3633_v34 = vld [vmem:[#allocation2 + $0x680] ss:$16 sps:$4 sm:$0xff]  }
 0x174   :  { %2307 = vmatprep.subr.bf16.mxu0 %v3569_v35  ;;  %2471 = vmatprep.subr.bf16.mxu1 %v3572_v36  ;;  %v3636_v35 = vld [vmem:[#allocation2 + $0x688] ss:$16 sps:$4 sm:$0xff]   ;;  %v3641_v36 = vld [vmem:[#allocation2 + $0x6a4] ss:$16 sps:$4 sm:$0xff]  }
 0x177   :  { %2308 = vmatpush1.bf16.msra.mxu0 %v3567_v0  ;;  %2472 = vmatpush1.bf16.msra.mxu1 %v3570_v37  ;;  %v3644_v0 = vld [vmem:[#allocation2 + $0x6ac] ss:$16 sps:$4 sm:$0xff]   ;;  %v3639_v37 = vld [vmem:[#allocation2 + $0x6a0] ss:$16 sps:$4 sm:$0xff]  }
 0x178   :  { %2309 = vmatprep.subr.bf16.mxu0 %v3575_v38  ;;  %2473 = vmatprep.subr.bf16.mxu1 %v3578_v39  ;;  %v3642_v38 = vld [vmem:[#allocation2 + $0x6a8] ss:$16 sps:$4 sm:$0xff]   ;;  %v3647_v39 = vld [vmem:[#allocation2 + $0x6c4] ss:$16 sps:$4 sm:$0xff]  }
 0x17b   :  { %2310 = vmatpush1.bf16.msra.mxu0 %v3573_v40  ;;  %2474 = vmatpush1.bf16.msra.mxu1 %v3576_v41  ;;  %v3650_v40 = vld [vmem:[#allocation2 + $0x6cc] ss:$16 sps:$4 sm:$0xff]   ;;  %v3645_v41 = vld [vmem:[#allocation2 + $0x6c0] ss:$16 sps:$4 sm:$0xff]  }
 0x17c   :  { %2311 = vmatprep.subr.bf16.mxu0 %v3581_v42  ;;  %2475 = vmatprep.subr.bf16.mxu1 %v3584_v43  ;;  %v3648_v42 = vld [vmem:[#allocation2 + $0x6c8] ss:$16 sps:$4 sm:$0xff]   ;;  %v3653_v43 = vld [vmem:[#allocation2 + $0x6e4] ss:$16 sps:$4 sm:$0xff]  }
 0x17f   :  { %2312 = vmatpush1.bf16.msra.mxu0 %v3579_v44  ;;  %2476 = vmatpush1.bf16.msra.mxu1 %v3582_v45  ;;  %v3656_v44 = vld [vmem:[#allocation2 + $0x6ec] ss:$16 sps:$4 sm:$0xff]   ;;  %v3651_v45 = vld [vmem:[#allocation2 + $0x6e0] ss:$16 sps:$4 sm:$0xff]  }
 0x180   :  { %2313 = vmatprep.subr.bf16.mxu0 %v3587_v46  ;;  %2477 = vmatprep.subr.bf16.mxu1 %v3590_v47  ;;  %v3654_v46 = vld [vmem:[#allocation2 + $0x6e8] ss:$16 sps:$4 sm:$0xff]   ;;  %v3659_v47 = vld [vmem:[#allocation2 + $0x704] ss:$16 sps:$4 sm:$0xff]  }
 0x183   :  { %2314 = vmatpush1.bf16.msra.mxu0 %v3585_v49  ;;  %2478 = vmatpush1.bf16.msra.mxu1 %v3588_v50  ;;  %v3657_v49 = vld [vmem:[#allocation2 + $0x700] ss:$16 sps:$4 sm:$0xff]   ;;  %v3660_v50 = vld [vmem:[#allocation2 + $0x708] ss:$16 sps:$4 sm:$0xff]  }
 0x184   :  { %2315 = vmatprep.subr.bf16.mxu0 %v3593_v51  ;;  %2479 = vmatprep.subr.bf16.mxu1 %v3596_v26  ;;  %v3665_v51 = vld [vmem:[#allocation2 + $0x724] ss:$16 sps:$4 sm:$0xff]   ;;  %v3668_v26 = vld [vmem:[#allocation2 + $0x72c] ss:$16 sps:$4 sm:$0xff]  }
 0x187   :  { %2316 = vmatpush1.bf16.msra.mxu0 %v3591_v54  ;;  %2480 = vmatpush1.bf16.msra.mxu1 %v3594_v55  ;;  %v3671_v54 = vld [vmem:[#allocation2 + $0x744] ss:$16 sps:$4 sm:$0xff]   ;;  %v3674_v55 = vld [vmem:[#allocation2 + $0x74c] ss:$16 sps:$4 sm:$0xff]  }
 0x188   :  { %2317 = vmatprep.subr.bf16.mxu0 %v3599_v56  ;;  %2481 = vmatprep.subr.bf16.mxu1 %v3602_v57  ;;  %v3669_v56 = vld [vmem:[#allocation2 + $0x740] ss:$16 sps:$4 sm:$0xff]   ;;  %v3672_v57 = vld [vmem:[#allocation2 + $0x748] ss:$16 sps:$4 sm:$0xff]  }
 0x18b   :  { %2318 = vmatpush1.bf16.msra.mxu0 %v3597_v61  ;;  %2482 = vmatpush1.bf16.msra.mxu1 %v3600_v62  ;;  %v3675_v61 = vld [vmem:[#allocation2 + $0x760] ss:$16 sps:$4 sm:$0xff]   ;;  %v3678_v62 = vld [vmem:[#allocation2 + $0x768] ss:$16 sps:$4 sm:$0xff]  }
 0x18c   :  { %2319 = vmatprep.subr.bf16.mxu0 %v3605_v63  ;;  %2483 = vmatprep.subr.bf16.mxu1 %v3608_v1  ;;  %v3683_v63 = vld [vmem:[#allocation2 + $0x784] ss:$16 sps:$4 sm:$0xff]   ;;  %v3686_v1 = vld [vmem:[#allocation2 + $0x78c] ss:$16 sps:$4 sm:$0xff]  }
 0x18f   :  { %2320 = vmatpush1.bf16.msra.mxu0 %v3603_v4  ;;  %2484 = vmatpush1.bf16.msra.mxu1 %v3606_v5  ;;  %v135_v4 = vsub.s32 6, %v4022_v8  ;;  %v3689_v5 = vld [vmem:[#allocation2 + $0x7a4] ss:$16 sps:$4 sm:$0xff]  }
 0x190   :  { %2330 = vmatprep.subr.bf16.mxu0 %v3611_v12  ;;  %2494 = vmatprep.subr.bf16.mxu1 %v3614_v13  ;;  %v3692_v12 = vld [vmem:[#allocation2 + $0x7ac] ss:$16 sps:$4 sm:$0xff]   ;;  %v3687_v13 = vld [vmem:[#allocation2 + $0x7a0] ss:$16 sps:$4 sm:$0xff]  }
 0x192   :  { %2322 = vmatmul.mubr.bf16.vlgmr.msra.gmra.mrb[8].mxu0 %v645_v16  ;;  %2486 = vmatmul.mubr.bf16.vlgmr.msra.gmra.mrb[8].mxu1 %v645_v16  ;;  %v136_v16 = vrot.slane %v4028_v10, %v135_v4  ;;  %v3705_v10 = vld [vmem:[%s4186_s5 + $0x40] sm:$0xff]  }
 0x193   :  { %2331 = vmatpush1.bf16.msra.mxu0 %v3609_v17  ;;  %2495 = vmatpush1.bf16.msra.mxu1 %v3612_v18  ;;  %v3695_v17 = vld [vmem:[#allocation2 + $0x7c4] ss:$16 sps:$4 sm:$0xff]   ;;  %v3698_v18 = vld [vmem:[#allocation2 + $0x7cc] ss:$16 sps:$4 sm:$0xff]  }
 0x194   :  { %2332 = vmatprep.subr.bf16.mxu0 %v3617_v19  ;;  %2496 = vmatprep.subr.bf16.mxu1 %v3620_v20  ;;  %v3693_v19 = vld [vmem:[#allocation2 + $0x7c0] ss:$16 sps:$4 sm:$0xff]   ;;  %v3696_v20 = vld [vmem:[#allocation2 + $0x7c8] ss:$16 sps:$4 sm:$0xff]  }
 0x195   :  { %2362 = vmatprep.mubr.bf16.mxu0 %v648_v14  ;;  %2526 = vmatprep.mubr.bf16.mxu1 %v648_v14  ;;  %v627_v14 = vadd.f32 %v4047_v7, %v136_v16  ;;  %v3707_v7 = vld [vmem:[%s4186_s5] sm:$0xff]  }
 0x197   :  { %2333 = vmatpush1.bf16.msra.mxu0 %v3615_v21  ;;  %2497 = vmatpush1.bf16.msra.mxu1 %v3618_v22  ;;  %v3701_v21 = vld [vmem:[#allocation2 + $0x7e4] ss:$16 sps:$4 sm:$0xff]   ;;  %v3704_v22 = vld [vmem:[#allocation2 + $0x7ec] ss:$16 sps:$4 sm:$0xff]  }
 0x198   :  { %2334 = vmatprep.subr.bf16.mxu0 %v3623_v23  ;;  %2498 = vmatprep.subr.bf16.mxu1 %v3626_v24  ;;  %v3699_v23 = vld [vmem:[#allocation2 + $0x7e0] ss:$16 sps:$4 sm:$0xff]   ;;  %v3702_v24 = vld [vmem:[#allocation2 + $0x7e8] ss:$16 sps:$4 sm:$0xff]  }
 0x19b   :  { %2335 = vmatpush1.bf16.msra.mxu0 %v3621_v6  ;;  %2499 = vmatpush1.bf16.msra.mxu1 %v3624_v25  ;;  %v639_v6 = vmax.f32 %v627_v14, 0.0  ;;  %v3706_v25 = vld [vmem:[%s4186_s5 + $0xc0] sm:$0xff]  }
 0x19c   :  { %2336 = vmatprep.subr.bf16.mxu0 %v3629_v27  ;;  %2500 = vmatprep.subr.bf16.mxu1 %v3632_v28  ;;  %v3708_v27 = vld [vmem:[%s4186_s5 + $0x80] sm:$0xff]  }
 0x19d   :  { %v647_v28 = vpack.c.bf16 %v639_v6, %v639_v6 }
 0x19f   :  { %2337 = vmatpush1.bf16.msra.mxu0 %v3627_v29  ;;  %2501 = vmatpush1.bf16.msra.mxu1 %v3630_v31  ;;  %v3709_v29 = vld [vmem:[%s4186_s5 + $0x48] sm:$0xff]  }
 0x1a0   :  { %2338 = vmatprep.subr.bf16.mxu0 %v3635_v32  ;;  %2502 = vmatprep.subr.bf16.mxu1 %v3638_v33  ;;  %v3710_v31 = vld [vmem:[%s4186_s5 + $0xc8] sm:$0xff]  }
 0x1a1   :  { %v3711_v32 = vld [vmem:[%s4186_s5 + $0x8] sm:$0xff]  }
 0x1a2   :  { %v3712_v33 = vld [vmem:[%s4186_s5 + $0x88] sm:$0xff]  }
 0x1a3   :  { %2339 = vmatpush1.bf16.msra.mxu0 %v3633_v34  ;;  %2503 = vmatpush1.bf16.msra.mxu1 %v3636_v35  ;;  %v3713_v34 = vld [vmem:[%s4186_s5 + $0x50] sm:$0xff]  }
 0x1a4   :  { %2340 = vmatprep.subr.bf16.mxu0 %v3641_v36  ;;  %2504 = vmatprep.subr.bf16.mxu1 %v3644_v0  ;;  %v3714_v35 = vld [vmem:[%s4186_s5 + $0xd0] sm:$0xff]  }
 0x1a5   :  { %v3715_v36 = vld [vmem:[%s4186_s5 + $0x10] sm:$0xff]  }
 0x1a6   :  { %v3716_v0 = vld [vmem:[%s4186_s5 + $0x90] sm:$0xff]  }
 0x1a7   :  { %2341 = vmatpush1.bf16.msra.mxu0 %v3639_v37  ;;  %2505 = vmatpush1.bf16.msra.mxu1 %v3642_v38  ;;  %v3717_v37 = vld [vmem:[%s4186_s5 + $0x58] sm:$0xff]  }
 0x1a8   :  { %2342 = vmatprep.subr.bf16.mxu0 %v3647_v39  ;;  %2506 = vmatprep.subr.bf16.mxu1 %v3650_v40  ;;  %v3718_v38 = vld [vmem:[%s4186_s5 + $0xd8] sm:$0xff]  }
 0x1a9   :  { %v3719_v39 = vld [vmem:[%s4186_s5 + $0x18] sm:$0xff]  }
 0x1aa   :  { %v3720_v40 = vld [vmem:[%s4186_s5 + $0x98] sm:$0xff]  }
 0x1ab   :  { %2343 = vmatpush1.bf16.msra.mxu0 %v3645_v41  ;;  %2507 = vmatpush1.bf16.msra.mxu1 %v3648_v42  ;;  %v3721_v41 = vld [vmem:[%s4186_s5 + $0x60] sm:$0xff]  }
 0x1ac   :  { %2344 = vmatprep.subr.bf16.mxu0 %v3653_v43  ;;  %2508 = vmatprep.subr.bf16.mxu1 %v3656_v44  ;;  %v3722_v42 = vld [vmem:[%s4186_s5 + $0xe0] sm:$0xff]  }
 0x1ad   :  { %v3723_v43 = vld [vmem:[%s4186_s5 + $0x20] sm:$0xff]  }
 0x1ae   :  { %v3724_v44 = vld [vmem:[%s4186_s5 + $0xa0] sm:$0xff]  }
 0x1af   :  { %2345 = vmatpush1.bf16.msra.mxu0 %v3651_v45  ;;  %2509 = vmatpush1.bf16.msra.mxu1 %v3654_v46  ;;  %v3725_v45 = vld [vmem:[%s4186_s5 + $0x68] sm:$0xff]  }
 0x1b0   :  { %2346 = vmatprep.subr.bf16.mxu0 %v3659_v47  ;;  %2510 = vmatprep.subr.bf16.mxu1 %v3662_v48  ;;  %v3726_v46 = vld [vmem:[%s4186_s5 + $0xe8] sm:$0xff]  }
 0x1b1   :  { %v3727_v47 = vld [vmem:[%s4186_s5 + $0x28] sm:$0xff]  }
 0x1b2   :  { %v3728_v48 = vld [vmem:[%s4186_s5 + $0xa8] sm:$0xff]  }
 0x1b3   :  { %2347 = vmatpush1.bf16.msra.mxu0 %v3657_v49  ;;  %2511 = vmatpush1.bf16.msra.mxu1 %v3660_v50  ;;  %v3729_v49 = vld [vmem:[%s4186_s5 + $0x70] sm:$0xff]  }
 0x1b4   :  { %2348 = vmatprep.subr.bf16.mxu0 %v3665_v51  ;;  %2512 = vmatprep.subr.bf16.mxu1 %v3668_v26  ;;  %v3730_v50 = vld [vmem:[%s4186_s5 + $0xf0] sm:$0xff]  }
 0x1b5   :  { %v3731_v51 = vld [vmem:[%s4186_s5 + $0x30] sm:$0xff]  }
 0x1b6   :  { %v3732_v26 = vld [vmem:[%s4186_s5 + $0xb0] sm:$0xff]  }
 0x1b7   :  { %2349 = vmatpush1.bf16.msra.mxu0 %v3663_v52  ;;  %2513 = vmatpush1.bf16.msra.mxu1 %v3666_v53  ;;  %v3733_v52 = vld [vmem:[%s4186_s5 + $0x78] sm:$0xff]  }
 0x1b8   :  { %2350 = vmatprep.subr.bf16.mxu0 %v3671_v54  ;;  %2514 = vmatprep.subr.bf16.mxu1 %v3674_v55  ;;  %v3734_v53 = vld [vmem:[%s4186_s5 + $0xf8] sm:$0xff]  }
 0x1b9   :  { %v3735_v54 = vld [vmem:[%s4186_s5 + $0x38] sm:$0xff]  }
 0x1ba   :  { %v3736_v55 = vld [vmem:[%s4186_s5 + $0xb8] sm:$0xff]  }
 0x1bb   :  { %2351 = vmatpush1.bf16.msra.mxu0 %v3669_v56  ;;  %2515 = vmatpush1.bf16.msra.mxu1 %v3672_v57  ;;  %v905_v56 = vld [vmem:[%s4185_s4] sm:$0xf] }
 0x1bc   :  { %2352 = vmatprep.subr.bf16.mxu0 %v3677_v58  ;;  %2516 = vmatprep.subr.bf16.mxu1 %v3680_v60  ;;  %v910_v57 = vrot.slane %v905_v56, %v111_v9  ;;  %v918_v58 = vrot.slane %v905_v56, %v119_v30  ;;  %v914_v60 = vrot.slane %v905_v56, %v115_v11 }
 0x1bf   :  { %2353 = vmatpush1.bf16.msra.mxu0 %v3675_v61  ;;  %2517 = vmatpush1.bf16.msra.mxu1 %v3678_v62  ;;  %v922_v61 = vrot.slane %v905_v56, %v123_v15 }
 0x1c0   :  { %2354 = vmatprep.subr.bf16.mxu0 %v3683_v63  ;;  %2518 = vmatprep.subr.bf16.mxu1 %v3686_v1 }
 0x1c3   :  { %2355 = vmatpush1.bf16.msra.mxu0 %v3681_v2  ;;  %2519 = vmatpush1.bf16.msra.mxu1 %v3684_v3 }
 0x1c4   :  { %2356 = vmatprep.subr.bf16.mxu0 %v3689_v5  ;;  %2520 = vmatprep.subr.bf16.mxu1 %v3692_v12 }
 0x1c7   :  { %2357 = vmatpush1.bf16.msra.mxu0 %v3687_v13  ;;  %2521 = vmatpush1.bf16.msra.mxu1 %v3690_v59 }
 0x1c8   :  { %2358 = vmatprep.subr.bf16.mxu0 %v3695_v17  ;;  %2522 = vmatprep.subr.bf16.mxu1 %v3698_v18 }
 0x1cb   :  { %2359 = vmatpush1.bf16.msra.mxu0 %v3693_v19  ;;  %2523 = vmatpush1.bf16.msra.mxu1 %v3696_v20 }
 0x1cc   :  { %2360 = vmatprep.subr.bf16.mxu0 %v3701_v21  ;;  %2524 = vmatprep.subr.bf16.mxu1 %v3704_v22  ;;  %v3212_v22 = vld [vmem:[%s4187_s6] ss:$0 sm:$0xff] }
 0x1cf   :  { %2361 = vmatpush1.bf16.msra.mxu0 %v3699_v23  ;;  %2525 = vmatpush1.bf16.msra.mxu1 %v3702_v24 }
 0x1d0   :  { %3245 = vmatprep.subr.bf16.mxu0 %v3705_v10  ;;  %3267 = vmatprep.subr.bf16.mxu1 %v3706_v25 }
 0x1d2   :  { %2363 = vmatmul.mubr.bf16.vlgmr.msra.gmra.mrb[8].mxu0 %v647_v28  ;;  %2527 = vmatmul.mubr.bf16.vlgmr.msra.gmra.mrb[8].mxu1 %v647_v28 }
 0x1d3   :  { %3246 = vmatpush3.bf16.msra.mxu0 %v3707_v7  ;;  %3268 = vmatpush3.bf16.msra.mxu1 %v3708_v27 }
 0x1d4   :  { %3247 = vmatprep.subr.bf16.mxu0 %v3709_v29  ;;  %3269 = vmatprep.subr.bf16.mxu1 %v3710_v31 }
 0x1d7   :  { %3248 = vmatpush3.bf16.msra.mxu0 %v3711_v32  ;;  %3270 = vmatpush3.bf16.msra.mxu1 %v3712_v33 }
 0x1d8   :  { %3249 = vmatprep.subr.bf16.mxu0 %v3713_v34  ;;  %3271 = vmatprep.subr.bf16.mxu1 %v3714_v35 }
 0x1db   :  { %3250 = vmatpush3.bf16.msra.mxu0 %v3715_v36  ;;  %3272 = vmatpush3.bf16.msra.mxu1 %v3716_v0 }
 0x1dc   :  { %3251 = vmatprep.subr.bf16.mxu0 %v3717_v37  ;;  %3273 = vmatprep.subr.bf16.mxu1 %v3718_v38 }
 0x1df   :  { %3252 = vmatpush3.bf16.msra.mxu0 %v3719_v39  ;;  %3274 = vmatpush3.bf16.msra.mxu1 %v3720_v40 }
 0x1e0   :  { %3253 = vmatprep.subr.bf16.mxu0 %v3721_v41  ;;  %3275 = vmatprep.subr.bf16.mxu1 %v3722_v42 }
 0x1e3   :  { %3254 = vmatpush3.bf16.msra.mxu0 %v3723_v43  ;;  %3276 = vmatpush3.bf16.msra.mxu1 %v3724_v44 }
 0x1e4   :  { %3255 = vmatprep.subr.bf16.mxu0 %v3725_v45  ;;  %3277 = vmatprep.subr.bf16.mxu1 %v3726_v46 }
 0x1e7   :  { %3256 = vmatpush3.bf16.msra.mxu0 %v3727_v47  ;;  %3278 = vmatpush3.bf16.msra.mxu1 %v3728_v48 }
 0x1e8   :  { %3257 = vmatprep.subr.bf16.mxu0 %v3729_v49  ;;  %3279 = vmatprep.subr.bf16.mxu1 %v3730_v50 }
 0x1eb   :  { %3258 = vmatpush3.bf16.msra.mxu0 %v3731_v51  ;;  %3280 = vmatpush3.bf16.msra.mxu1 %v3732_v26 }
 0x1ec   :  { %3259 = vmatprep.subr.bf16.mxu0 %v3733_v52  ;;  %3281 = vmatprep.subr.bf16.mxu1 %v3734_v53 }
 0x1ef   :  { %3260 = vmatpush3.bf16.msra.mxu0 %v3735_v54  ;;  %3282 = vmatpush3.bf16.msra.mxu1 %v3736_v55 }
 0x2a5   :  { %v2364_v62 = vpop.f32.mrb[8].mxu0  ;;  %v2528_v63 = vpop.f32.mrb[8].mxu1 }
 0x2a6   :  { %v3289_v1 = vadd.f32 %v2364_v62, %v910_v57  ;;  %v3291_v2 = vadd.f32 %v2528_v63, %v918_v58  ;;  %v2366_v3 = vpop.f32.mrb[9].mxu0  ;;  %v2530_v4 = vpop.f32.mrb[9].mxu1 }
 0x2a7   :  { %v3290_v5 = vadd.f32 %v2366_v3, %v914_v60  ;;  %v3292_v12 = vadd.f32 %v2530_v4, %v922_v61  ;;  %v2368_v13 = vpop.f32.mrb[10].mxu0  ;;  %v2532_v59 = vpop.f32.mrb[10].mxu1 }
 0x2a8   :  { %v2535_v9 = vmax.f32 %v3289_v1, 0.0  ;;  %v2537_v16 = vmax.f32 %v3291_v2, 0.0  ;;  %v2369_v17 = vpop.f32.mrb[11].mxu0  ;;  %v2533_v30 = vpop.f32.mrb[11].mxu1 }
 0x2a9   :  { %v2536_v18 = vmax.f32 %v3290_v5, 0.0  ;;  %v2538_v19 = vmax.f32 %v3292_v12, 0.0 }
 0x2aa   :  { %v2539_v8 = vpack.c.bf16 %v2535_v9, %v2535_v9  ;;  %v2541_v15 = vpack.c.bf16 %v2537_v16, %v2537_v16 }
 0x2ab   :  { %v2540_v11 = vpack.c.bf16 %v2536_v18, %v2536_v18  ;;  %v2542_v20 = vpack.c.bf16 %v2538_v19, %v2538_v19 }
 0x2ad   :  { %2838 = vmatprep.mubr.bf16.mxu0 %v2540_v11  ;;  %2878 = vmatprep.mubr.bf16.mxu1 %v2542_v20 }
 0x2ae   :  { %2839 = vmatmul.mubr.bf16.vlgmr.msra.gmra.mrb[12].mxu0 %v2539_v8  ;;  %2879 = vmatmul.mubr.bf16.vlgmr.msra.gmra.mrb[12].mxu1 %v2541_v15 }
 0x381   :  { %v3261_v14 = vpop.f32.mrb[12].mxu0  ;;  %v3283_v21 = vpop.f32.mrb[12].mxu1 }
 0x382   :  { %v3262_v23 = vpop.f32.mrb[13].mxu0  ;;  %v3284_v24 = vpop.f32.mrb[13].mxu1 }
 0x383   :  { %v3263_v6 = vadd.f32 %v3262_v23, %v3261_v14  ;;  %v3285_v10 = vadd.f32 %v3284_v24, %v3283_v21  ;;  %v3264_v25 = vpop.f32.mrb[14].mxu0  ;;  %v3286_v7 = vpop.f32.mrb[14].mxu1 }
 0x384   :  { %v3265_v27 = vpop.f32.mrb[15].mxu0  ;;  %v3287_v28 = vpop.f32.mrb[15].mxu1 }
 0x385   :  { %v2841_v29 = vadd.f32 %v3263_v6, %v3212_v22 }
 0x387   :  { %v2881_v31 = vadd.f32 %v3285_v10, %v2841_v29 }
 0x389   :  { %2886 = vst [vmem:[%s4188_s7] sm:$0xff] %v2881_v31 }
 0x38a   :  { %2891 = vsyncpa [#allocation3], 1 }

</bundles_post_ra>
